<compile_context>
chip_gen: v5e
topology: v5e:2x2
jax: 0.10.0
libtpu: 0.0.40
codegen_flags: <defaults>
</compile_context>

<pallas_src>
import functools

import jax
import jax.numpy as jnp
from jax.experimental import pallas as pl
from jax.experimental.pallas import tpu as pltpu

_BN_EPS = 1e-5
_LEAKY_SLOPE = 0.01  # PyTorch nn.LeakyReLU default


def _conv_cfg(C_in):
    # (C_in, C_out, kernel, stride, padding) for the 5 conv stages.
    return [
        (C_in, 16, 64, 16, 1),
        (16,   32,  3,  1, 1),
        (32,   64,  2,  1, 1),
        (64,   64,  3,  1, 1),
        (64,   64,  3,  1, 0),
    ]


# ----------------------------------------------------------------------------
# The single fused kernel
# ----------------------------------------------------------------------------
def _maxpool2_rows(y):
    """MaxPool1d(kernel=2, stride=2) over rows of a (Lout, C) tile.

    Uses exact one-hot row-selection matmuls (rides the MXU, no strided access),
    then an elementwise max.  Trailing odd row is dropped (PyTorch semantics).
    """
    lout, _ = y.shape
    lh = lout // 2
    rows = jax.lax.broadcasted_iota(jnp.int32, (lh, lout), 0)
    cols = jax.lax.broadcasted_iota(jnp.int32, (lh, lout), 1)
    sel_even = (cols == 2 * rows).astype(jnp.float32)
    sel_odd = (cols == 2 * rows + 1).astype(jnp.float32)
    return jnp.maximum(
        jnp.dot(sel_even, y, preferred_element_type=jnp.float32),
        jnp.dot(sel_odd, y, preferred_element_type=jnp.float32),
    )


def _wdcnn3_kernel(
    x_ref,                         # (1, Lout1, k1*Cin) conv1 im2col patches (this batch row)
    w1, b1,                        # conv1: (k1*Cin, 16) BN-folded weight, (1, 16) shift
    w2, b2, w3, b3, w4, b4, w5, b5,  # convs 2..5: (k, Cin, Cout) BN-folded, (1, Cout) shift
    fc1w, fc1b, fc2w, fc2b,        # fc stack
    hw, hb,                        # merged head GEMM: [classifier | domain_fc1]
    dw, db,                        # domain classifier final linear (100 -> 2)
    cls_ref, dom_ref,              # outputs: (1, 1, class_num), (1, 1, 2)
    buf2, buf3, buf4, buf5,        # VMEM scratch: zero-padded inputs of convs 2..5
    *, stage_meta, class_num,
):
    f32 = jnp.float32

    # ---- conv1 (k=64, s=16) + folded BN + ReLU, then fused pool -------------
    y = jnp.dot(x_ref[0], w1[...], preferred_element_type=f32) + b1[...]
    y = jnp.maximum(y, 0.0)
    h = _maxpool2_rows(y)                                   # (Lh1, 16)

    # ---- conv2..conv5: tap-sum matmuls over zero-padded VMEM buffers --------
    stages = ((w2, b2, buf2), (w3, b3, buf3), (w4, b4, buf4), (w5, b5, buf5))
    for (k, pad, l_in, l_out, _l_half, _cin, _cout), (w, b, buf) in zip(stage_meta, stages):
        if pad:
            buf[...] = jnp.zeros(buf.shape, f32)            # zero the halo rows
        buf[pad:pad + l_in, :] = h                          # place previous activation
        acc = jnp.dot(buf[0:l_out, :], w[0], preferred_element_type=f32)
        for t in range(1, k):
            acc = acc + jnp.dot(buf[t:t + l_out, :], w[t], preferred_element_type=f32)
        y = jnp.maximum(acc + b[...], 0.0)                  # folded BN shift + ReLU
        h = _maxpool2_rows(y)                               # fused MaxPool1d(2, 2)

    feat = h                                                # (1, 64): final length is 1

    # ---- fc stack ------------------------------------------------------------
    h = jnp.maximum(jnp.dot(feat, fc1w[...], preferred_element_type=f32) + fc1b[...], 0.0)
    h = jnp.maximum(jnp.dot(h, fc2w[...], preferred_element_type=f32) + fc2b[...], 0.0)

    # ---- merged head GEMM: [classifier logits | domain fc1] share input h ----
    hh = jnp.dot(h, hw[...], preferred_element_type=f32) + hb[...]     # (1, class_num+100)
    cls_logits = hh[:, :class_num]
    d = hh[:, class_num:]
    d = jnp.where(d >= 0.0, d, _LEAKY_SLOPE * d)            # LeakyReLU
    dom_logits = jnp.dot(d, dw[...], preferred_element_type=f32) + db[...]   # (1, 2)

    def _log_softmax(z):
        z = z - jnp.max(z, axis=-1, keepdims=True)
        return z - jnp.log(jnp.sum(jnp.exp(z), axis=-1, keepdims=True))

    cls_ref[0] = _log_softmax(cls_logits)
    dom_ref[0] = _log_softmax(dom_logits)


def _const_map(ndim):
    return lambda b: (0,) * ndim


# ----------------------------------------------------------------------------
# Parameter preparation (BN folding, matmul layouts, merged head)
# ----------------------------------------------------------------------------
def prepare_params(raw, C_in, class_num):
    del class_num
    cfg = _conv_cfg(C_in)
    conv_w, conv_b = [], []
    for p, (cin, cout, k, s, _pad) in zip(raw["convs"], cfg):
        w_kco = jnp.transpose(p["w"], (2, 1, 0))            # (k, Cin, Cout)
        if s > 1:   # conv1: full im2col weight matrix (k*Cin, Cout), scale folded in
            wm = w_kco.reshape(k * cin, cout) * p["scale"][None, :]
        else:       # convs 2..5: per-tap (k, Cin, Cout), scale folded in
            wm = w_kco * p["scale"][None, None, :]
        conv_w.append(wm)
        conv_b.append(p["shift"].reshape(1, cout))
    return {
        "conv_w": conv_w,
        "conv_b": conv_b,
        "fc1_w": raw["fc1_w"], "fc1_b": raw["fc1_b"].reshape(1, -1),
        "fc2_w": raw["fc2_w"], "fc2_b": raw["fc2_b"].reshape(1, -1),
        "head_w": jnp.concatenate([raw["cls_w"], raw["dfc1_w"]], axis=1),
        "head_b": jnp.concatenate([raw["cls_b"], raw["dfc1_b"]]).reshape(1, -1),
        "dcls_w": raw["dcls_w"], "dcls_b": raw["dcls_b"].reshape(1, -1),
    }


# ----------------------------------------------------------------------------
# Forward pass (single pallas_call)
# ----------------------------------------------------------------------------
def wdcnn3_forward(params, x_ncl, alpha, *, C_in, class_num):
    # TODO(synk): ReverseLayerF (gradient reversal) has backward-only semantics;
    # its forward is identity, so alpha is unused here.
    del alpha
    cfg = _conv_cfg(C_in)
    B, C, L = x_ncl.shape
    assert C == C_in

    # ---- static shape bookkeeping -------------------------------------------
    _cin1, cout1, k1, s1, p1 = cfg[0]
    assert k1 % s1 == 0
    lout1 = (L + 2 * p1 - k1) // s1 + 1
    lh1 = lout1 // 2
    nblk = lout1 + k1 // s1 - 1                 # stride-sized input blocks needed

    stage_meta = []
    l_in = lh1
    for (cin, cout, k, s, pad) in cfg[1:]:
        assert s == 1
        l_out = l_in + 2 * pad - k + 1
        l_half = l_out // 2
        stage_meta.append((k, pad, l_in, l_out, l_half, cin, cout))
        l_in = l_half
    assert l_in == 1, f"cfg requires final conv length 1 (got {l_in}); use e.g. L=1024"

    # ---- conv1 im2col patches: pad/reshape/slice/concat only (no gather) -----
    x = jnp.transpose(x_ncl, (0, 2, 1))                       # (B, L, Cin) channels-last
    xp = jnp.pad(x, ((0, 0), (p1, p1), (0, 0)))
    xb = xp[:, :nblk * s1, :].reshape(B, nblk, s1 * C_in)     # (B, nblk, s1*Cin)
    patches = jnp.concatenate(
        [xb[:, t:t + lout1, :] for t in range(k1 // s1)], axis=-1)  # (B, lout1, k1*Cin)

    weight_args = [params["conv_w"][0], params["conv_b"][0]]
    for i in range(1, len(cfg)):
        weight_args += [params["conv_w"][i], params["conv_b"][i]]
    weight_args += [params["fc1_w"], params["fc1_b"],
                    params["fc2_w"], params["fc2_b"],
                    params["head_w"], params["head_b"],
                    params["dcls_w"], params["dcls_b"]]

    in_specs = [pl.BlockSpec((1, lout1, k1 * C_in), lambda b: (b, 0, 0))]
    in_specs += [pl.BlockSpec(w.shape, _const_map(w.ndim)) for w in weight_args]

    out_shape = (jax.ShapeDtypeStruct((B, 1, class_num), jnp.float32),
                 jax.ShapeDtypeStruct((B, 1, 2), jnp.float32))
    out_specs = (pl.BlockSpec((1, 1, class_num), lambda b: (b, 0, 0)),
                 pl.BlockSpec((1, 1, 2), lambda b: (b, 0, 0)))

    scratch_shapes = [pltpu.VMEM((l_in_i + 2 * pad_i, cin_i), jnp.float32)
                      for (_k, pad_i, l_in_i, _lo, _lh, cin_i, _co) in stage_meta]

    kernel = functools.partial(_wdcnn3_kernel,
                               stage_meta=tuple(stage_meta), class_num=class_num)

    cls_out, dom_out = pl.pallas_call(
        kernel,
        out_shape=out_shape,
        grid=(B,),
        in_specs=in_specs,
        out_specs=out_specs,
        scratch_shapes=scratch_shapes,
        compiler_params=pltpu.CompilerParams(
            dimension_semantics=("parallel",)),   # batch rows across TCs on v7x
    )(patches, *weight_args)

    return cls_out.reshape(B, class_num), dom_out.reshape(B, 2)


# ----------------------------------------------------------------------------
# Deterministic synthetic parameters (BN kept raw; folded in prepare_params)
# ----------------------------------------------------------------------------
def init_params(key, C_in, class_num):
    cfg = _conv_cfg(C_in)
    n_keys = 6 * len(cfg) + 2 * 5
    keys = iter(jax.random.split(key, n_keys))

    convs = []
    for (cin, cout, k, _s, _p) in cfg:
        w = jax.random.normal(next(keys), (cout, cin, k), jnp.float32) / jnp.sqrt(cin * k)
        b = 0.05 * jax.random.normal(next(keys), (cout,), jnp.float32)
        gamma = 1.0 + 0.1 * jax.random.normal(next(keys), (cout,), jnp.float32)
        beta = 0.1 * jax.random.normal(next(keys), (cout,), jnp.float32)
        rmean = 0.1 * jax.random.normal(next(keys), (cout,), jnp.float32)
        rvar = 1.0 + 0.1 * jax.random.uniform(next(keys), (cout,), jnp.float32)
        scale = gamma / jnp.sqrt(rvar + _BN_EPS)        # eval-mode BN
        shift = beta + (b - rmean) * scale
        convs.append({"w": w, "scale": scale, "shift": shift})

    def lin(k1, k2, fin, fout):
        w = jax.random.normal(k1, (fin, fout), jnp.float32) / jnp.sqrt(fin)
        b = 0.05 * jax.random.normal(k2, (fout,), jnp.float32)
        return w, b

    fc1_w, fc1_b = lin(next(keys), next(keys), 64, 100)
    fc2_w, fc2_b = lin(next(keys), next(keys), 100, 100)
    cls_w, cls_b = lin(next(keys), next(keys), 100, class_num)
    dfc1_w, dfc1_b = lin(next(keys), next(keys), 100, 100)
    dcls_w, dcls_b = lin(next(keys), next(keys), 100, 2)

    return {"convs": convs,
            "fc1_w": fc1_w, "fc1_b": fc1_b,
            "fc2_w": fc2_w, "fc2_b": fc2_b,
            "cls_w": cls_w, "cls_b": cls_b,
            "dfc1_w": dfc1_w, "dfc1_b": dfc1_b,
            "dcls_w": dcls_w, "dcls_b": dcls_b}


# ----------------------------------------------------------------------------
# Pure-JAX (non-Pallas) reference for correctness checking
# ----------------------------------------------------------------------------
def reference_forward(raw, x_ncl, alpha, C_in, class_num):
    del alpha, class_num
    cfg = _conv_cfg(C_in)
    x = jnp.transpose(x_ncl, (0, 2, 1))
    B = x.shape[0]
    for p, (cin, cout, k, s, pad) in zip(raw["convs"], cfg):
        xp = jnp.pad(x, ((0, 0), (pad, pad), (0, 0)))
        l_out = (xp.shape[1] - k) // s + 1
        idx = (jnp.arange(l_out) * s)[:, None] + jnp.arange(k)[None, :]
        patches = xp[:, idx, :].reshape(B, l_out, k * cin)
        wm = jnp.transpose(p["w"], (2, 1, 0)).reshape(k * cin, cout)
        y = jnp.einsum("blk,kc->blc", patches, wm) * p["scale"] + p["shift"]
        y = jnp.maximum(y, 0.0)
        lh = l_out // 2
        x = jnp.maximum(y[:, 0:2 * lh:2, :], y[:, 1:2 * lh:2, :])
    feat = x.reshape(B, -1)
    h = jnp.maximum(feat @ raw["fc1_w"] + raw["fc1_b"], 0.0)
    h = jnp.maximum(h @ raw["fc2_w"] + raw["fc2_b"], 0.0)
    cls = jax.nn.log_softmax(h @ raw["cls_w"] + raw["cls_b"], axis=-1)
    d = h @ raw["dfc1_w"] + raw["dfc1_b"]
    d = jnp.where(d >= 0.0, d, _LEAKY_SLOPE * d)
    dom = jax.nn.log_softmax(d @ raw["dcls_w"] + raw["dcls_b"], axis=-1)
    return cls, dom


# ----------------------------------------------------------------------------
if __name__ == "__main__":
    # The fc expects 64 flattened features, which forces the final conv length
    # to 1 -> L = 1024 is the natural small size for this architecture.
    B, C_in, L, class_num = 2, 2, 1024, 4

    key = jax.random.PRNGKey(0)
    k_params, k_x = jax.random.split(key)
    raw = init_params(k_params, C_in, class_num)
    params = prepare_params(raw, C_in, class_num)
    x = jax.random.normal(k_x, (B, C_in, L), dtype=jnp.float32)   # NCL like PyTorch
    alpha = jnp.float32(0.5)

    fwd = jax.jit(functools.partial(wdcnn3_forward, C_in=C_in, class_num=class_num))
    cls_out, dom_out = fwd(params, x, alpha)
    jax.block_until_ready((cls_out, dom_out))

    assert cls_out.shape == (B, class_num)
    assert dom_out.shape == (B, 2)
    # log-softmax rows must sum to ~1 in prob space
    assert jnp.allclose(jnp.sum(jnp.exp(cls_out), axis=1), 1.0, atol=1e-4)
    assert jnp.allclose(jnp.sum(jnp.exp(dom_out), axis=1), 1.0, atol=1e-4)

    # match the pure-JAX reference implementation
    ref_cls, ref_dom = reference_forward(raw, x, alpha, C_in, class_num)
    assert jnp.allclose(cls_out, ref_cls, atol=2e-3, rtol=2e-3), \
        float(jnp.max(jnp.abs(cls_out - ref_cls)))
    assert jnp.allclose(dom_out, ref_dom, atol=2e-3, rtol=2e-3), \
        float(jnp.max(jnp.abs(dom_out - ref_dom)))

    print("KERNEL_OK")
</pallas_src>

<mosaic_0001>
module attributes {stable_mosaic.version = 11 : i64} {
  func.func @_wdcnn3_kernel(%arg0: i32, %arg1: memref<1x61x128xf32, #tpu.memory_space<vmem>>, %arg2: memref<128x16xf32, #tpu.memory_space<vmem>>, %arg3: memref<1x16xf32, #tpu.memory_space<vmem>>, %arg4: memref<3x16x32xf32, #tpu.memory_space<vmem>>, %arg5: memref<1x32xf32, #tpu.memory_space<vmem>>, %arg6: memref<2x32x64xf32, #tpu.memory_space<vmem>>, %arg7: memref<1x64xf32, #tpu.memory_space<vmem>>, %arg8: memref<3x64x64xf32, #tpu.memory_space<vmem>>, %arg9: memref<1x64xf32, #tpu.memory_space<vmem>>, %arg10: memref<3x64x64xf32, #tpu.memory_space<vmem>>, %arg11: memref<1x64xf32, #tpu.memory_space<vmem>>, %arg12: memref<64x100xf32, #tpu.memory_space<vmem>>, %arg13: memref<1x100xf32, #tpu.memory_space<vmem>>, %arg14: memref<100x100xf32, #tpu.memory_space<vmem>>, %arg15: memref<1x100xf32, #tpu.memory_space<vmem>>, %arg16: memref<100x104xf32, #tpu.memory_space<vmem>>, %arg17: memref<1x104xf32, #tpu.memory_space<vmem>>, %arg18: memref<100x2xf32, #tpu.memory_space<vmem>>, %arg19: memref<1x2xf32, #tpu.memory_space<vmem>>, %arg20: memref<1x1x4xf32, #tpu.memory_space<vmem>>, %arg21: memref<1x1x2xf32, #tpu.memory_space<vmem>>, %arg22: memref<32x16xf32, #tpu.memory_space<vmem>>, %arg23: memref<17x32xf32, #tpu.memory_space<vmem>>, %arg24: memref<10x64xf32, #tpu.memory_space<vmem>>, %arg25: memref<4x64xf32, #tpu.memory_space<vmem>>) attributes {dimension_semantics = [#tpu.dimension_semantics<parallel>], iteration_bounds = array<i64: 2>, scalar_prefetch = 0 : i64, scratch_operands = 4 : i64, tpu.core_type = #tpu.core_type<tc>, window_params = [{transform_indices = @transform_0, window_bounds = array<i64: 1, 61, 128>}, {pipeline_mode = #tpu.pipeline_mode<synchronous>, transform_indices = @transform_1, window_bounds = array<i64: 128, 16>}, {pipeline_mode = #tpu.pipeline_mode<synchronous>, transform_indices = @transform_2, window_bounds = array<i64: 1, 16>}, {pipeline_mode = #tpu.pipeline_mode<synchronous>, transform_indices = @transform_3, window_bounds = array<i64: 3, 16, 32>}, {pipeline_mode = #tpu.pipeline_mode<synchronous>, transform_indices = @transform_4, window_bounds = array<i64: 1, 32>}, {pipeline_mode = #tpu.pipeline_mode<synchronous>, transform_indices = @transform_5, window_bounds = array<i64: 2, 32, 64>}, {pipeline_mode = #tpu.pipeline_mode<synchronous>, transform_indices = @transform_6, window_bounds = array<i64: 1, 64>}, {pipeline_mode = #tpu.pipeline_mode<synchronous>, transform_indices = @transform_7, window_bounds = array<i64: 3, 64, 64>}, {pipeline_mode = #tpu.pipeline_mode<synchronous>, transform_indices = @transform_8, window_bounds = array<i64: 1, 64>}, {pipeline_mode = #tpu.pipeline_mode<synchronous>, transform_indices = @transform_9, window_bounds = array<i64: 3, 64, 64>}, {pipeline_mode = #tpu.pipeline_mode<synchronous>, transform_indices = @transform_10, window_bounds = array<i64: 1, 64>}, {pipeline_mode = #tpu.pipeline_mode<synchronous>, transform_indices = @transform_11, window_bounds = array<i64: 64, 100>}, {pipeline_mode = #tpu.pipeline_mode<synchronous>, transform_indices = @transform_12, window_bounds = array<i64: 1, 100>}, {pipeline_mode = #tpu.pipeline_mode<synchronous>, transform_indices = @transform_13, window_bounds = array<i64: 100, 100>}, {pipeline_mode = #tpu.pipeline_mode<synchronous>, transform_indices = @transform_14, window_bounds = array<i64: 1, 100>}, {pipeline_mode = #tpu.pipeline_mode<synchronous>, transform_indices = @transform_15, window_bounds = array<i64: 100, 104>}, {pipeline_mode = #tpu.pipeline_mode<synchronous>, transform_indices = @transform_16, window_bounds = array<i64: 1, 104>}, {pipeline_mode = #tpu.pipeline_mode<synchronous>, transform_indices = @transform_17, window_bounds = array<i64: 100, 2>}, {pipeline_mode = #tpu.pipeline_mode<synchronous>, transform_indices = @transform_18, window_bounds = array<i64: 1, 2>}, {transform_indices = @transform_19, window_bounds = array<i64: 1, 1, 4>}, {transform_indices = @transform_20, window_bounds = array<i64: 1, 1, 2>}]} {
    %c0 = arith.constant 0 : index
    %c0_0 = arith.constant 0 : index
    %c0_1 = arith.constant 0 : index
    %0 = vector.load %arg1[%c0, %c0_0, %c0_1] : memref<1x61x128xf32, #tpu.memory_space<vmem>>, vector<1x61x128xf32>
    %1 = vector.shape_cast %0 : vector<1x61x128xf32> to vector<61x128xf32>
    %c0_2 = arith.constant 0 : index
    %c0_3 = arith.constant 0 : index
    %2 = vector.load %arg2[%c0_2, %c0_3] : memref<128x16xf32, #tpu.memory_space<vmem>>, vector<128x16xf32>
    %cst = arith.constant dense<0.000000e+00> : vector<61x16xf32>
    %3 = tpu.matmul %1, %2, %cst {dimension_numbers = #tpu.dot_dimension_numbers<[1], [0], [0], [1], [0, 0, 1, 1], [], []>} : vector<61x128xf32>, vector<128x16xf32>, vector<61x16xf32> -> vector<61x16xf32>
    %c0_4 = arith.constant 0 : index
    %c0_5 = arith.constant 0 : index
    %4 = vector.load %arg3[%c0_4, %c0_5] : memref<1x16xf32, #tpu.memory_space<vmem>>, vector<1x16xf32>
    %5 = vector.broadcast %4 : vector<1x16xf32> to vector<61x16xf32>
    %6 = arith.addf %3, %5 : vector<61x16xf32>
    %cst_6 = arith.constant 0.000000e+00 : f32
    %7 = vector.broadcast %cst_6 : f32 to vector<61x16xf32>
    %8 = arith.maximumf %6, %7 : vector<61x16xf32>
    %9 = tpu.iota {dimensions = array<i32: 0>} : vector<30x61xi32>
    %10 = tpu.iota {dimensions = array<i32: 1>} : vector<30x61xi32>
    %c2_i32 = arith.constant 2 : i32
    %11 = vector.broadcast %c2_i32 : i32 to vector<30x61xi32>
    %12 = arith.muli %11, %9 : vector<30x61xi32>
    %13 = arith.cmpi eq, %10, %12 : vector<30x61xi32>
    %14 = arith.extui %13 : vector<30x61xi1> to vector<30x61xi32>
    %15 = arith.sitofp %14 : vector<30x61xi32> to vector<30x61xf32>
    %c2_i32_7 = arith.constant 2 : i32
    %16 = vector.broadcast %c2_i32_7 : i32 to vector<30x61xi32>
    %17 = arith.muli %16, %9 : vector<30x61xi32>
    %c1_i32 = arith.constant 1 : i32
    %18 = vector.broadcast %c1_i32 : i32 to vector<30x61xi32>
    %19 = arith.addi %17, %18 : vector<30x61xi32>
    %20 = arith.cmpi eq, %10, %19 : vector<30x61xi32>
    %21 = arith.extui %20 : vector<30x61xi1> to vector<30x61xi32>
    %22 = arith.sitofp %21 : vector<30x61xi32> to vector<30x61xf32>
    %cst_8 = arith.constant dense<0.000000e+00> : vector<30x16xf32>
    %23 = tpu.matmul %15, %8, %cst_8 {dimension_numbers = #tpu.dot_dimension_numbers<[1], [0], [0], [1], [0, 0, 1, 1], [], []>} : vector<30x61xf32>, vector<61x16xf32>, vector<30x16xf32> -> vector<30x16xf32>
    %cst_9 = arith.constant dense<0.000000e+00> : vector<30x16xf32>
    %24 = tpu.matmul %22, %8, %cst_9 {dimension_numbers = #tpu.dot_dimension_numbers<[1], [0], [0], [1], [0, 0, 1, 1], [], []>} : vector<30x61xf32>, vector<61x16xf32>, vector<30x16xf32> -> vector<30x16xf32>
    %25 = arith.maximumf %23, %24 : vector<30x16xf32>
    %cst_10 = arith.constant 0.000000e+00 : f32
    %26 = vector.broadcast %cst_10 : f32 to vector<32x16xf32>
    %c0_11 = arith.constant 0 : index
    %c0_12 = arith.constant 0 : index
    %27 = vector.load %arg22[%c0_11, %c0_12] : memref<32x16xf32, #tpu.memory_space<vmem>>, vector<32x16xf32>
    tpu.vector_store %arg22[%c0_11, %c0_12], %26 {strides = array<i32>} : memref<32x16xf32, #tpu.memory_space<vmem>>, vector<32x16xf32>,
    %c1 = arith.constant 1 : index
    %c0_13 = arith.constant 0 : index
    %28 = vector.load %arg22[%c1, %c0_13] : memref<32x16xf32, #tpu.memory_space<vmem>>, vector<30x16xf32>
    tpu.vector_store %arg22[%c1, %c0_13], %25 {strides = array<i32>} : memref<32x16xf32, #tpu.memory_space<vmem>>, vector<30x16xf32>,
    %c0_14 = arith.constant 0 : index
    %c0_15 = arith.constant 0 : index
    %29 = vector.load %arg22[%c0_14, %c0_15] : memref<32x16xf32, #tpu.memory_space<vmem>>, vector<30x16xf32>
    %c0_16 = arith.constant 0 : index
    %c0_17 = arith.constant 0 : index
    %c0_18 = arith.constant 0 : index
    %30 = vector.load %arg4[%c0_16, %c0_17, %c0_18] : memref<3x16x32xf32, #tpu.memory_space<vmem>>, vector<1x16x32xf32>
    %31 = vector.shape_cast %30 : vector<1x16x32xf32> to vector<16x32xf32>
    %cst_19 = arith.constant dense<0.000000e+00> : vector<30x32xf32>
    %32 = tpu.matmul %29, %31, %cst_19 {dimension_numbers = #tpu.dot_dimension_numbers<[1], [0], [0], [1], [0, 0, 1, 1], [], []>} : vector<30x16xf32>, vector<16x32xf32>, vector<30x32xf32> -> vector<30x32xf32>
    %c1_20 = arith.constant 1 : index
    %c0_21 = arith.constant 0 : index
    %33 = vector.load %arg22[%c1_20, %c0_21] : memref<32x16xf32, #tpu.memory_space<vmem>>, vector<30x16xf32>
    %c1_22 = arith.constant 1 : index
    %c0_23 = arith.constant 0 : index
    %c0_24 = arith.constant 0 : index
    %34 = vector.load %arg4[%c1_22, %c0_23, %c0_24] : memref<3x16x32xf32, #tpu.memory_space<vmem>>, vector<1x16x32xf32>
    %35 = vector.shape_cast %34 : vector<1x16x32xf32> to vector<16x32xf32>
    %cst_25 = arith.constant dense<0.000000e+00> : vector<30x32xf32>
    %36 = tpu.matmul %33, %35, %cst_25 {dimension_numbers = #tpu.dot_dimension_numbers<[1], [0], [0], [1], [0, 0, 1, 1], [], []>} : vector<30x16xf32>, vector<16x32xf32>, vector<30x32xf32> -> vector<30x32xf32>
    %37 = arith.addf %32, %36 : vector<30x32xf32>
    %c2 = arith.constant 2 : index
    %c0_26 = arith.constant 0 : index
    %38 = vector.load %arg22[%c2, %c0_26] : memref<32x16xf32, #tpu.memory_space<vmem>>, vector<30x16xf32>
    %c2_27 = arith.constant 2 : index
    %c0_28 = arith.constant 0 : index
    %c0_29 = arith.constant 0 : index
    %39 = vector.load %arg4[%c2_27, %c0_28, %c0_29] : memref<3x16x32xf32, #tpu.memory_space<vmem>>, vector<1x16x32xf32>
    %40 = vector.shape_cast %39 : vector<1x16x32xf32> to vector<16x32xf32>
    %cst_30 = arith.constant dense<0.000000e+00> : vector<30x32xf32>
    %41 = tpu.matmul %38, %40, %cst_30 {dimension_numbers = #tpu.dot_dimension_numbers<[1], [0], [0], [1], [0, 0, 1, 1], [], []>} : vector<30x16xf32>, vector<16x32xf32>, vector<30x32xf32> -> vector<30x32xf32>
    %42 = arith.addf %37, %41 : vector<30x32xf32>
    %c0_31 = arith.constant 0 : index
    %c0_32 = arith.constant 0 : index
    %43 = vector.load %arg5[%c0_31, %c0_32] : memref<1x32xf32, #tpu.memory_space<vmem>>, vector<1x32xf32>
    %44 = vector.broadcast %43 : vector<1x32xf32> to vector<30x32xf32>
    %45 = arith.addf %42, %44 : vector<30x32xf32>
    %cst_33 = arith.constant 0.000000e+00 : f32
    %46 = vector.broadcast %cst_33 : f32 to vector<30x32xf32>
    %47 = arith.maximumf %45, %46 : vector<30x32xf32>
    %48 = tpu.iota {dimensions = array<i32: 0>} : vector<15x30xi32>
    %49 = tpu.iota {dimensions = array<i32: 1>} : vector<15x30xi32>
    %c2_i32_34 = arith.constant 2 : i32
    %50 = vector.broadcast %c2_i32_34 : i32 to vector<15x30xi32>
    %51 = arith.muli %50, %48 : vector<15x30xi32>
    %52 = arith.cmpi eq, %49, %51 : vector<15x30xi32>
    %53 = arith.extui %52 : vector<15x30xi1> to vector<15x30xi32>
    %54 = arith.sitofp %53 : vector<15x30xi32> to vector<15x30xf32>
    %c2_i32_35 = arith.constant 2 : i32
    %55 = vector.broadcast %c2_i32_35 : i32 to vector<15x30xi32>
    %56 = arith.muli %55, %48 : vector<15x30xi32>
    %c1_i32_36 = arith.constant 1 : i32
    %57 = vector.broadcast %c1_i32_36 : i32 to vector<15x30xi32>
    %58 = arith.addi %56, %57 : vector<15x30xi32>
    %59 = arith.cmpi eq, %49, %58 : vector<15x30xi32>
    %60 = arith.extui %59 : vector<15x30xi1> to vector<15x30xi32>
    %61 = arith.sitofp %60 : vector<15x30xi32> to vector<15x30xf32>
    %cst_37 = arith.constant dense<0.000000e+00> : vector<15x32xf32>
    %62 = tpu.matmul %54, %47, %cst_37 {dimension_numbers = #tpu.dot_dimension_numbers<[1], [0], [0], [1], [0, 0, 1, 1], [], []>} : vector<15x30xf32>, vector<30x32xf32>, vector<15x32xf32> -> vector<15x32xf32>
    %cst_38 = arith.constant dense<0.000000e+00> : vector<15x32xf32>
    %63 = tpu.matmul %61, %47, %cst_38 {dimension_numbers = #tpu.dot_dimension_numbers<[1], [0], [0], [1], [0, 0, 1, 1], [], []>} : vector<15x30xf32>, vector<30x32xf32>, vector<15x32xf32> -> vector<15x32xf32>
    %64 = arith.maximumf %62, %63 : vector<15x32xf32>
    %cst_39 = arith.constant 0.000000e+00 : f32
    %65 = vector.broadcast %cst_39 : f32 to vector<17x32xf32>
    %c0_40 = arith.constant 0 : index
    %c0_41 = arith.constant 0 : index
    %66 = vector.load %arg23[%c0_40, %c0_41] : memref<17x32xf32, #tpu.memory_space<vmem>>, vector<17x32xf32>
    tpu.vector_store %arg23[%c0_40, %c0_41], %65 {strides = array<i32>} : memref<17x32xf32, #tpu.memory_space<vmem>>, vector<17x32xf32>,
    %c1_42 = arith.constant 1 : index
    %c0_43 = arith.constant 0 : index
    %67 = vector.load %arg23[%c1_42, %c0_43] : memref<17x32xf32, #tpu.memory_space<vmem>>, vector<15x32xf32>
    tpu.vector_store %arg23[%c1_42, %c0_43], %64 {strides = array<i32>} : memref<17x32xf32, #tpu.memory_space<vmem>>, vector<15x32xf32>,
    %c0_44 = arith.constant 0 : index
    %c0_45 = arith.constant 0 : index
    %68 = vector.load %arg23[%c0_44, %c0_45] : memref<17x32xf32, #tpu.memory_space<vmem>>, vector<16x32xf32>
    %c0_46 = arith.constant 0 : index
    %c0_47 = arith.constant 0 : index
    %c0_48 = arith.constant 0 : index
    %69 = vector.load %arg6[%c0_46, %c0_47, %c0_48] : memref<2x32x64xf32, #tpu.memory_space<vmem>>, vector<1x32x64xf32>
    %70 = vector.shape_cast %69 : vector<1x32x64xf32> to vector<32x64xf32>
    %cst_49 = arith.constant dense<0.000000e+00> : vector<16x64xf32>
    %71 = tpu.matmul %68, %70, %cst_49 {dimension_numbers = #tpu.dot_dimension_numbers<[1], [0], [0], [1], [0, 0, 1, 1], [], []>} : vector<16x32xf32>, vector<32x64xf32>, vector<16x64xf32> -> vector<16x64xf32>
    %c1_50 = arith.constant 1 : index
    %c0_51 = arith.constant 0 : index
    %72 = vector.load %arg23[%c1_50, %c0_51] : memref<17x32xf32, #tpu.memory_space<vmem>>, vector<16x32xf32>
    %c1_52 = arith.constant 1 : index
    %c0_53 = arith.constant 0 : index
    %c0_54 = arith.constant 0 : index
    %73 = vector.load %arg6[%c1_52, %c0_53, %c0_54] : memref<2x32x64xf32, #tpu.memory_space<vmem>>, vector<1x32x64xf32>
    %74 = vector.shape_cast %73 : vector<1x32x64xf32> to vector<32x64xf32>
    %cst_55 = arith.constant dense<0.000000e+00> : vector<16x64xf32>
    %75 = tpu.matmul %72, %74, %cst_55 {dimension_numbers = #tpu.dot_dimension_numbers<[1], [0], [0], [1], [0, 0, 1, 1], [], []>} : vector<16x32xf32>, vector<32x64xf32>, vector<16x64xf32> -> vector<16x64xf32>
    %76 = arith.addf %71, %75 : vector<16x64xf32>
    %c0_56 = arith.constant 0 : index
    %c0_57 = arith.constant 0 : index
    %77 = vector.load %arg7[%c0_56, %c0_57] : memref<1x64xf32, #tpu.memory_space<vmem>>, vector<1x64xf32>
    %78 = vector.broadcast %77 : vector<1x64xf32> to vector<16x64xf32>
    %79 = arith.addf %76, %78 : vector<16x64xf32>
    %cst_58 = arith.constant 0.000000e+00 : f32
    %80 = vector.broadcast %cst_58 : f32 to vector<16x64xf32>
    %81 = arith.maximumf %79, %80 : vector<16x64xf32>
    %82 = tpu.iota {dimensions = array<i32: 0>} : vector<8x16xi32>
    %83 = tpu.iota {dimensions = array<i32: 1>} : vector<8x16xi32>
    %c2_i32_59 = arith.constant 2 : i32
    %84 = vector.broadcast %c2_i32_59 : i32 to vector<8x16xi32>
    %85 = arith.muli %84, %82 : vector<8x16xi32>
    %86 = arith.cmpi eq, %83, %85 : vector<8x16xi32>
    %87 = arith.extui %86 : vector<8x16xi1> to vector<8x16xi32>
    %88 = arith.sitofp %87 : vector<8x16xi32> to vector<8x16xf32>
    %c2_i32_60 = arith.constant 2 : i32
    %89 = vector.broadcast %c2_i32_60 : i32 to vector<8x16xi32>
    %90 = arith.muli %89, %82 : vector<8x16xi32>
    %c1_i32_61 = arith.constant 1 : i32
    %91 = vector.broadcast %c1_i32_61 : i32 to vector<8x16xi32>
    %92 = arith.addi %90, %91 : vector<8x16xi32>
    %93 = arith.cmpi eq, %83, %92 : vector<8x16xi32>
    %94 = arith.extui %93 : vector<8x16xi1> to vector<8x16xi32>
    %95 = arith.sitofp %94 : vector<8x16xi32> to vector<8x16xf32>
    %cst_62 = arith.constant dense<0.000000e+00> : vector<8x64xf32>
    %96 = tpu.matmul %88, %81, %cst_62 {dimension_numbers = #tpu.dot_dimension_numbers<[1], [0], [0], [1], [0, 0, 1, 1], [], []>} : vector<8x16xf32>, vector<16x64xf32>, vector<8x64xf32> -> vector<8x64xf32>
    %cst_63 = arith.constant dense<0.000000e+00> : vector<8x64xf32>
    %97 = tpu.matmul %95, %81, %cst_63 {dimension_numbers = #tpu.dot_dimension_numbers<[1], [0], [0], [1], [0, 0, 1, 1], [], []>} : vector<8x16xf32>, vector<16x64xf32>, vector<8x64xf32> -> vector<8x64xf32>
    %98 = arith.maximumf %96, %97 : vector<8x64xf32>
    %cst_64 = arith.constant 0.000000e+00 : f32
    %99 = vector.broadcast %cst_64 : f32 to vector<10x64xf32>
    %c0_65 = arith.constant 0 : index
    %c0_66 = arith.constant 0 : index
    %100 = vector.load %arg24[%c0_65, %c0_66] : memref<10x64xf32, #tpu.memory_space<vmem>>, vector<10x64xf32>
    tpu.vector_store %arg24[%c0_65, %c0_66], %99 {strides = array<i32>} : memref<10x64xf32, #tpu.memory_space<vmem>>, vector<10x64xf32>,
    %c1_67 = arith.constant 1 : index
    %c0_68 = arith.constant 0 : index
    %101 = vector.load %arg24[%c1_67, %c0_68] : memref<10x64xf32, #tpu.memory_space<vmem>>, vector<8x64xf32>
    tpu.vector_store %arg24[%c1_67, %c0_68], %98 {strides = array<i32>} : memref<10x64xf32, #tpu.memory_space<vmem>>, vector<8x64xf32>,
    %c0_69 = arith.constant 0 : index
    %c0_70 = arith.constant 0 : index
    %102 = vector.load %arg24[%c0_69, %c0_70] : memref<10x64xf32, #tpu.memory_space<vmem>>, vector<8x64xf32>
    %c0_71 = arith.constant 0 : index
    %c0_72 = arith.constant 0 : index
    %c0_73 = arith.constant 0 : index
    %103 = vector.load %arg8[%c0_71, %c0_72, %c0_73] : memref<3x64x64xf32, #tpu.memory_space<vmem>>, vector<1x64x64xf32>
    %104 = vector.shape_cast %103 : vector<1x64x64xf32> to vector<64x64xf32>
    %cst_74 = arith.constant dense<0.000000e+00> : vector<8x64xf32>
    %105 = tpu.matmul %102, %104, %cst_74 {dimension_numbers = #tpu.dot_dimension_numbers<[1], [0], [0], [1], [0, 0, 1, 1], [], []>} : vector<8x64xf32>, vector<64x64xf32>, vector<8x64xf32> -> vector<8x64xf32>
    %c1_75 = arith.constant 1 : index
    %c0_76 = arith.constant 0 : index
    %106 = vector.load %arg24[%c1_75, %c0_76] : memref<10x64xf32, #tpu.memory_space<vmem>>, vector<8x64xf32>
    %c1_77 = arith.constant 1 : index
    %c0_78 = arith.constant 0 : index
    %c0_79 = arith.constant 0 : index
    %107 = vector.load %arg8[%c1_77, %c0_78, %c0_79] : memref<3x64x64xf32, #tpu.memory_space<vmem>>, vector<1x64x64xf32>
    %108 = vector.shape_cast %107 : vector<1x64x64xf32> to vector<64x64xf32>
    %cst_80 = arith.constant dense<0.000000e+00> : vector<8x64xf32>
    %109 = tpu.matmul %106, %108, %cst_80 {dimension_numbers = #tpu.dot_dimension_numbers<[1], [0], [0], [1], [0, 0, 1, 1], [], []>} : vector<8x64xf32>, vector<64x64xf32>, vector<8x64xf32> -> vector<8x64xf32>
    %110 = arith.addf %105, %109 : vector<8x64xf32>
    %c2_81 = arith.constant 2 : index
    %c0_82 = arith.constant 0 : index
    %111 = vector.load %arg24[%c2_81, %c0_82] : memref<10x64xf32, #tpu.memory_space<vmem>>, vector<8x64xf32>
    %c2_83 = arith.constant 2 : index
    %c0_84 = arith.constant 0 : index
    %c0_85 = arith.constant 0 : index
    %112 = vector.load %arg8[%c2_83, %c0_84, %c0_85] : memref<3x64x64xf32, #tpu.memory_space<vmem>>, vector<1x64x64xf32>
    %113 = vector.shape_cast %112 : vector<1x64x64xf32> to vector<64x64xf32>
    %cst_86 = arith.constant dense<0.000000e+00> : vector<8x64xf32>
    %114 = tpu.matmul %111, %113, %cst_86 {dimension_numbers = #tpu.dot_dimension_numbers<[1], [0], [0], [1], [0, 0, 1, 1], [], []>} : vector<8x64xf32>, vector<64x64xf32>, vector<8x64xf32> -> vector<8x64xf32>
    %115 = arith.addf %110, %114 : vector<8x64xf32>
    %c0_87 = arith.constant 0 : index
    %c0_88 = arith.constant 0 : index
    %116 = vector.load %arg9[%c0_87, %c0_88] : memref<1x64xf32, #tpu.memory_space<vmem>>, vector<1x64xf32>
    %117 = vector.broadcast %116 : vector<1x64xf32> to vector<8x64xf32>
    %118 = arith.addf %115, %117 : vector<8x64xf32>
    %cst_89 = arith.constant 0.000000e+00 : f32
    %119 = vector.broadcast %cst_89 : f32 to vector<8x64xf32>
    %120 = arith.maximumf %118, %119 : vector<8x64xf32>
    %121 = tpu.iota {dimensions = array<i32: 0>} : vector<4x8xi32>
    %122 = tpu.iota {dimensions = array<i32: 1>} : vector<4x8xi32>
    %c2_i32_90 = arith.constant 2 : i32
    %123 = vector.broadcast %c2_i32_90 : i32 to vector<4x8xi32>
    %124 = arith.muli %123, %121 : vector<4x8xi32>
    %125 = arith.cmpi eq, %122, %124 : vector<4x8xi32>
    %126 = arith.extui %125 : vector<4x8xi1> to vector<4x8xi32>
    %127 = arith.sitofp %126 : vector<4x8xi32> to vector<4x8xf32>
    %c2_i32_91 = arith.constant 2 : i32
    %128 = vector.broadcast %c2_i32_91 : i32 to vector<4x8xi32>
    %129 = arith.muli %128, %121 : vector<4x8xi32>
    %c1_i32_92 = arith.constant 1 : i32
    %130 = vector.broadcast %c1_i32_92 : i32 to vector<4x8xi32>
    %131 = arith.addi %129, %130 : vector<4x8xi32>
    %132 = arith.cmpi eq, %122, %131 : vector<4x8xi32>
    %133 = arith.extui %132 : vector<4x8xi1> to vector<4x8xi32>
    %134 = arith.sitofp %133 : vector<4x8xi32> to vector<4x8xf32>
    %cst_93 = arith.constant dense<0.000000e+00> : vector<4x64xf32>
    %135 = tpu.matmul %127, %120, %cst_93 {dimension_numbers = #tpu.dot_dimension_numbers<[1], [0], [0], [1], [0, 0, 1, 1], [], []>} : vector<4x8xf32>, vector<8x64xf32>, vector<4x64xf32> -> vector<4x64xf32>
    %cst_94 = arith.constant dense<0.000000e+00> : vector<4x64xf32>
    %136 = tpu.matmul %134, %120, %cst_94 {dimension_numbers = #tpu.dot_dimension_numbers<[1], [0], [0], [1], [0, 0, 1, 1], [], []>} : vector<4x8xf32>, vector<8x64xf32>, vector<4x64xf32> -> vector<4x64xf32>
    %137 = arith.maximumf %135, %136 : vector<4x64xf32>
    %c0_95 = arith.constant 0 : index
    %c0_96 = arith.constant 0 : index
    %138 = vector.load %arg25[%c0_95, %c0_96] : memref<4x64xf32, #tpu.memory_space<vmem>>, vector<4x64xf32>
    tpu.vector_store %arg25[%c0_95, %c0_96], %137 {strides = array<i32>} : memref<4x64xf32, #tpu.memory_space<vmem>>, vector<4x64xf32>,
    %c0_97 = arith.constant 0 : index
    %c0_98 = arith.constant 0 : index
    %139 = vector.load %arg25[%c0_97, %c0_98] : memref<4x64xf32, #tpu.memory_space<vmem>>, vector<2x64xf32>
    %c0_99 = arith.constant 0 : index
    %c0_100 = arith.constant 0 : index
    %c0_101 = arith.constant 0 : index
    %140 = vector.load %arg10[%c0_99, %c0_100, %c0_101] : memref<3x64x64xf32, #tpu.memory_space<vmem>>, vector<1x64x64xf32>
    %141 = vector.shape_cast %140 : vector<1x64x64xf32> to vector<64x64xf32>
    %cst_102 = arith.constant dense<0.000000e+00> : vector<2x64xf32>
    %142 = tpu.matmul %139, %141, %cst_102 {dimension_numbers = #tpu.dot_dimension_numbers<[1], [0], [0], [1], [0, 0, 1, 1], [], []>} : vector<2x64xf32>, vector<64x64xf32>, vector<2x64xf32> -> vector<2x64xf32>
    %c1_103 = arith.constant 1 : index
    %c0_104 = arith.constant 0 : index
    %143 = vector.load %arg25[%c1_103, %c0_104] : memref<4x64xf32, #tpu.memory_space<vmem>>, vector<2x64xf32>
    %c1_105 = arith.constant 1 : index
    %c0_106 = arith.constant 0 : index
    %c0_107 = arith.constant 0 : index
    %144 = vector.load %arg10[%c1_105, %c0_106, %c0_107] : memref<3x64x64xf32, #tpu.memory_space<vmem>>, vector<1x64x64xf32>
    %145 = vector.shape_cast %144 : vector<1x64x64xf32> to vector<64x64xf32>
    %cst_108 = arith.constant dense<0.000000e+00> : vector<2x64xf32>
    %146 = tpu.matmul %143, %145, %cst_108 {dimension_numbers = #tpu.dot_dimension_numbers<[1], [0], [0], [1], [0, 0, 1, 1], [], []>} : vector<2x64xf32>, vector<64x64xf32>, vector<2x64xf32> -> vector<2x64xf32>
    %147 = arith.addf %142, %146 : vector<2x64xf32>
    %c2_109 = arith.constant 2 : index
    %c0_110 = arith.constant 0 : index
    %148 = vector.load %arg25[%c2_109, %c0_110] : memref<4x64xf32, #tpu.memory_space<vmem>>, vector<2x64xf32>
    %c2_111 = arith.constant 2 : index
    %c0_112 = arith.constant 0 : index
    %c0_113 = arith.constant 0 : index
    %149 = vector.load %arg10[%c2_111, %c0_112, %c0_113] : memref<3x64x64xf32, #tpu.memory_space<vmem>>, vector<1x64x64xf32>
    %150 = vector.shape_cast %149 : vector<1x64x64xf32> to vector<64x64xf32>
    %cst_114 = arith.constant dense<0.000000e+00> : vector<2x64xf32>
    %151 = tpu.matmul %148, %150, %cst_114 {dimension_numbers = #tpu.dot_dimension_numbers<[1], [0], [0], [1], [0, 0, 1, 1], [], []>} : vector<2x64xf32>, vector<64x64xf32>, vector<2x64xf32> -> vector<2x64xf32>
    %152 = arith.addf %147, %151 : vector<2x64xf32>
    %c0_115 = arith.constant 0 : index
    %c0_116 = arith.constant 0 : index
    %153 = vector.load %arg11[%c0_115, %c0_116] : memref<1x64xf32, #tpu.memory_space<vmem>>, vector<1x64xf32>
    %154 = vector.broadcast %153 : vector<1x64xf32> to vector<2x64xf32>
    %155 = arith.addf %152, %154 : vector<2x64xf32>
    %cst_117 = arith.constant 0.000000e+00 : f32
    %156 = vector.broadcast %cst_117 : f32 to vector<2x64xf32>
    %157 = arith.maximumf %155, %156 : vector<2x64xf32>
    %158 = tpu.iota {dimensions = array<i32: 0>} : vector<1x2xi32>
    %159 = tpu.iota {dimensions = array<i32: 1>} : vector<1x2xi32>
    %c2_i32_118 = arith.constant 2 : i32
    %160 = vector.broadcast %c2_i32_118 : i32 to vector<1x2xi32>
    %161 = arith.muli %160, %158 : vector<1x2xi32>
    %162 = arith.cmpi eq, %159, %161 : vector<1x2xi32>
    %163 = arith.extui %162 : vector<1x2xi1> to vector<1x2xi32>
    %164 = arith.sitofp %163 : vector<1x2xi32> to vector<1x2xf32>
    %c2_i32_119 = arith.constant 2 : i32
    %165 = vector.broadcast %c2_i32_119 : i32 to vector<1x2xi32>
    %166 = arith.muli %165, %158 : vector<1x2xi32>
    %c1_i32_120 = arith.constant 1 : i32
    %167 = vector.broadcast %c1_i32_120 : i32 to vector<1x2xi32>
    %168 = arith.addi %166, %167 : vector<1x2xi32>
    %169 = arith.cmpi eq, %159, %168 : vector<1x2xi32>
    %170 = arith.extui %169 : vector<1x2xi1> to vector<1x2xi32>
    %171 = arith.sitofp %170 : vector<1x2xi32> to vector<1x2xf32>
    %cst_121 = arith.constant dense<0.000000e+00> : vector<1x64xf32>
    %172 = tpu.matmul %164, %157, %cst_121 {dimension_numbers = #tpu.dot_dimension_numbers<[1], [0], [0], [1], [0, 0, 1, 1], [], []>} : vector<1x2xf32>, vector<2x64xf32>, vector<1x64xf32> -> vector<1x64xf32>
    %cst_122 = arith.constant dense<0.000000e+00> : vector<1x64xf32>
    %173 = tpu.matmul %171, %157, %cst_122 {dimension_numbers = #tpu.dot_dimension_numbers<[1], [0], [0], [1], [0, 0, 1, 1], [], []>} : vector<1x2xf32>, vector<2x64xf32>, vector<1x64xf32> -> vector<1x64xf32>
    %174 = arith.maximumf %172, %173 : vector<1x64xf32>
    %c0_123 = arith.constant 0 : index
    %c0_124 = arith.constant 0 : index
    %175 = vector.load %arg12[%c0_123, %c0_124] : memref<64x100xf32, #tpu.memory_space<vmem>>, vector<64x100xf32>
    %cst_125 = arith.constant dense<0.000000e+00> : vector<1x100xf32>
    %176 = tpu.matmul %174, %175, %cst_125 {dimension_numbers = #tpu.dot_dimension_numbers<[1], [0], [0], [1], [0, 0, 1, 1], [], []>} : vector<1x64xf32>, vector<64x100xf32>, vector<1x100xf32> -> vector<1x100xf32>
    %c0_126 = arith.constant 0 : index
    %c0_127 = arith.constant 0 : index
    %177 = vector.load %arg13[%c0_126, %c0_127] : memref<1x100xf32, #tpu.memory_space<vmem>>, vector<1x100xf32>
    %178 = arith.addf %176, %177 : vector<1x100xf32>
    %cst_128 = arith.constant 0.000000e+00 : f32
    %179 = vector.broadcast %cst_128 : f32 to vector<1x100xf32>
    %180 = arith.maximumf %178, %179 : vector<1x100xf32>
    %c0_129 = arith.constant 0 : index
    %c0_130 = arith.constant 0 : index
    %181 = vector.load %arg14[%c0_129, %c0_130] : memref<100x100xf32, #tpu.memory_space<vmem>>, vector<100x100xf32>
    %cst_131 = arith.constant dense<0.000000e+00> : vector<1x100xf32>
    %182 = tpu.matmul %180, %181, %cst_131 {dimension_numbers = #tpu.dot_dimension_numbers<[1], [0], [0], [1], [0, 0, 1, 1], [], []>} : vector<1x100xf32>, vector<100x100xf32>, vector<1x100xf32> -> vector<1x100xf32>
    %c0_132 = arith.constant 0 : index
    %c0_133 = arith.constant 0 : index
    %183 = vector.load %arg15[%c0_132, %c0_133] : memref<1x100xf32, #tpu.memory_space<vmem>>, vector<1x100xf32>
    %184 = arith.addf %182, %183 : vector<1x100xf32>
    %cst_134 = arith.constant 0.000000e+00 : f32
    %185 = vector.broadcast %cst_134 : f32 to vector<1x100xf32>
    %186 = arith.maximumf %184, %185 : vector<1x100xf32>
    %c0_135 = arith.constant 0 : index
    %c0_136 = arith.constant 0 : index
    %187 = vector.load %arg16[%c0_135, %c0_136] : memref<100x104xf32, #tpu.memory_space<vmem>>, vector<100x104xf32>
    %cst_137 = arith.constant dense<0.000000e+00> : vector<1x104xf32>
    %188 = tpu.matmul %186, %187, %cst_137 {dimension_numbers = #tpu.dot_dimension_numbers<[1], [0], [0], [1], [0, 0, 1, 1], [], []>} : vector<1x100xf32>, vector<100x104xf32>, vector<1x104xf32> -> vector<1x104xf32>
    %c0_138 = arith.constant 0 : index
    %c0_139 = arith.constant 0 : index
    %189 = vector.load %arg17[%c0_138, %c0_139] : memref<1x104xf32, #tpu.memory_space<vmem>>, vector<1x104xf32>
    %190 = arith.addf %188, %189 : vector<1x104xf32>
    %191 = vector.extract_strided_slice %190 {offsets = [0, 0], sizes = [1, 4], strides = [1, 1]} : vector<1x104xf32> to vector<1x4xf32>
    %192 = vector.extract_strided_slice %190 {offsets = [0, 4], sizes = [1, 100], strides = [1, 1]} : vector<1x104xf32> to vector<1x100xf32>
    %cst_140 = arith.constant 0.000000e+00 : f32
    %193 = vector.broadcast %cst_140 : f32 to vector<1x100xf32>
    %194 = arith.cmpf oge, %192, %193 : vector<1x100xf32>
    %cst_141 = arith.constant 0.00999999977 : f32
    %195 = vector.broadcast %cst_141 : f32 to vector<1x100xf32>
    %196 = arith.mulf %195, %192 : vector<1x100xf32>
    %197 = arith.select %194, %192, %196 : vector<1x100xi1>, vector<1x100xf32>
    %c0_142 = arith.constant 0 : index
    %c0_143 = arith.constant 0 : index
    %198 = vector.load %arg18[%c0_142, %c0_143] : memref<100x2xf32, #tpu.memory_space<vmem>>, vector<100x2xf32>
    %cst_144 = arith.constant dense<0.000000e+00> : vector<1x2xf32>
    %199 = tpu.matmul %197, %198, %cst_144 {dimension_numbers = #tpu.dot_dimension_numbers<[1], [0], [0], [1], [0, 0, 1, 1], [], []>} : vector<1x100xf32>, vector<100x2xf32>, vector<1x2xf32> -> vector<1x2xf32>
    %c0_145 = arith.constant 0 : index
    %c0_146 = arith.constant 0 : index
    %200 = vector.load %arg19[%c0_145, %c0_146] : memref<1x2xf32, #tpu.memory_space<vmem>>, vector<1x2xf32>
    %201 = arith.addf %199, %200 : vector<1x2xf32>
    %cst_147 = arith.constant dense<0xFF800000> : vector<1xf32>
    %202 = vector.multi_reduction <maximumf>, %191, %cst_147 [1] : vector<1x4xf32> to vector<1xf32>
    %203 = vector.shape_cast %202 : vector<1xf32> to vector<1x1xf32>
    %204 = vector.broadcast %203 : vector<1x1xf32> to vector<1x4xf32>
    %205 = arith.subf %191, %204 : vector<1x4xf32>
    %206 = math.exp %205 : vector<1x4xf32>
    %cst_148 = arith.constant dense<0.000000e+00> : vector<1xf32>
    %207 = vector.multi_reduction <add>, %206, %cst_148 [1] : vector<1x4xf32> to vector<1xf32>
    %208 = vector.shape_cast %207 : vector<1xf32> to vector<1x1xf32>
    %209 = math.log %208 : vector<1x1xf32>
    %210 = vector.broadcast %209 : vector<1x1xf32> to vector<1x4xf32>
    %211 = arith.subf %205, %210 : vector<1x4xf32>
    %c0_149 = arith.constant 0 : index
    %c0_150 = arith.constant 0 : index
    %c0_151 = arith.constant 0 : index
    %212 = vector.load %arg20[%c0_149, %c0_150, %c0_151] : memref<1x1x4xf32, #tpu.memory_space<vmem>>, vector<1x1x4xf32>
    %213 = vector.shape_cast %212 : vector<1x1x4xf32> to vector<1x4xf32>
    %214 = vector.shape_cast %211 : vector<1x4xf32> to vector<1x1x4xf32>
    tpu.vector_store %arg20[%c0_149, %c0_150, %c0_151], %214 {strides = array<i32>} : memref<1x1x4xf32, #tpu.memory_space<vmem>>, vector<1x1x4xf32>,
    %cst_152 = arith.constant dense<0xFF800000> : vector<1xf32>
    %215 = vector.multi_reduction <maximumf>, %201, %cst_152 [1] : vector<1x2xf32> to vector<1xf32>
    %216 = vector.shape_cast %215 : vector<1xf32> to vector<1x1xf32>
    %217 = vector.broadcast %216 : vector<1x1xf32> to vector<1x2xf32>
    %218 = arith.subf %201, %217 : vector<1x2xf32>
    %219 = math.exp %218 : vector<1x2xf32>
    %cst_153 = arith.constant dense<0.000000e+00> : vector<1xf32>
    %220 = vector.multi_reduction <add>, %219, %cst_153 [1] : vector<1x2xf32> to vector<1xf32>
    %221 = vector.shape_cast %220 : vector<1xf32> to vector<1x1xf32>
    %222 = math.log %221 : vector<1x1xf32>
    %223 = vector.broadcast %222 : vector<1x1xf32> to vector<1x2xf32>
    %224 = arith.subf %218, %223 : vector<1x2xf32>
    %c0_154 = arith.constant 0 : index
    %c0_155 = arith.constant 0 : index
    %c0_156 = arith.constant 0 : index
    %225 = vector.load %arg21[%c0_154, %c0_155, %c0_156] : memref<1x1x2xf32, #tpu.memory_space<vmem>>, vector<1x1x2xf32>
    %226 = vector.shape_cast %225 : vector<1x1x2xf32> to vector<1x2xf32>
    %227 = vector.shape_cast %224 : vector<1x2xf32> to vector<1x1x2xf32>
    tpu.vector_store %arg21[%c0_154, %c0_155, %c0_156], %227 {strides = array<i32>} : memref<1x1x2xf32, #tpu.memory_space<vmem>>, vector<1x1x2xf32>,
    return
  }
  func.func @transform_0(%arg0: i32) -> (i32, i32, i32) {
    %c0_i32 = arith.constant 0 : i32
    %c0_i32_0 = arith.constant 0 : i32
    %c0_i32_1 = arith.constant 0 : i32
    return %arg0, %c0_i32, %c0_i32_0 : i32, i32, i32
  }
  func.func @transform_1(%arg0: i32) -> (i32, i32) {
    %c0_i32 = arith.constant 0 : i32
    %c0_i32_0 = arith.constant 0 : i32
    %c0_i32_1 = arith.constant 0 : i32
    return %c0_i32, %c0_i32_0 : i32, i32
  }
  func.func @transform_2(%arg0: i32) -> (i32, i32) {
    %c0_i32 = arith.constant 0 : i32
    %c0_i32_0 = arith.constant 0 : i32
    %c0_i32_1 = arith.constant 0 : i32
    return %c0_i32, %c0_i32_0 : i32, i32
  }
  func.func @transform_3(%arg0: i32) -> (i32, i32, i32) {
    %c0_i32 = arith.constant 0 : i32
    %c0_i32_0 = arith.constant 0 : i32
    %c0_i32_1 = arith.constant 0 : i32
    %c0_i32_2 = arith.constant 0 : i32
    return %c0_i32, %c0_i32_0, %c0_i32_1 : i32, i32, i32
  }
  func.func @transform_4(%arg0: i32) -> (i32, i32) {
    %c0_i32 = arith.constant 0 : i32
    %c0_i32_0 = arith.constant 0 : i32
    %c0_i32_1 = arith.constant 0 : i32
    return %c0_i32, %c0_i32_0 : i32, i32
  }
  func.func @transform_5(%arg0: i32) -> (i32, i32, i32) {
    %c0_i32 = arith.constant 0 : i32
    %c0_i32_0 = arith.constant 0 : i32
    %c0_i32_1 = arith.constant 0 : i32
    %c0_i32_2 = arith.constant 0 : i32
    return %c0_i32, %c0_i32_0, %c0_i32_1 : i32, i32, i32
  }
  func.func @transform_6(%arg0: i32) -> (i32, i32) {
    %c0_i32 = arith.constant 0 : i32
    %c0_i32_0 = arith.constant 0 : i32
    %c0_i32_1 = arith.constant 0 : i32
    return %c0_i32, %c0_i32_0 : i32, i32
  }
  func.func @transform_7(%arg0: i32) -> (i32, i32, i32) {
    %c0_i32 = arith.constant 0 : i32
    %c0_i32_0 = arith.constant 0 : i32
    %c0_i32_1 = arith.constant 0 : i32
    %c0_i32_2 = arith.constant 0 : i32
    return %c0_i32, %c0_i32_0, %c0_i32_1 : i32, i32, i32
  }
  func.func @transform_8(%arg0: i32) -> (i32, i32) {
    %c0_i32 = arith.constant 0 : i32
    %c0_i32_0 = arith.constant 0 : i32
    %c0_i32_1 = arith.constant 0 : i32
    return %c0_i32, %c0_i32_0 : i32, i32
  }
  func.func @transform_9(%arg0: i32) -> (i32, i32, i32) {
    %c0_i32 = arith.constant 0 : i32
    %c0_i32_0 = arith.constant 0 : i32
    %c0_i32_1 = arith.constant 0 : i32
    %c0_i32_2 = arith.constant 0 : i32
    return %c0_i32, %c0_i32_0, %c0_i32_1 : i32, i32, i32
  }
  func.func @transform_10(%arg0: i32) -> (i32, i32) {
    %c0_i32 = arith.constant 0 : i32
    %c0_i32_0 = arith.constant 0 : i32
    %c0_i32_1 = arith.constant 0 : i32
    return %c0_i32, %c0_i32_0 : i32, i32
  }
  func.func @transform_11(%arg0: i32) -> (i32, i32) {
    %c0_i32 = arith.constant 0 : i32
    %c0_i32_0 = arith.constant 0 : i32
    %c0_i32_1 = arith.constant 0 : i32
    return %c0_i32, %c0_i32_0 : i32, i32
  }
  func.func @transform_12(%arg0: i32) -> (i32, i32) {
    %c0_i32 = arith.constant 0 : i32
    %c0_i32_0 = arith.constant 0 : i32
    %c0_i32_1 = arith.constant 0 : i32
    return %c0_i32, %c0_i32_0 : i32, i32
  }
  func.func @transform_13(%arg0: i32) -> (i32, i32) {
    %c0_i32 = arith.constant 0 : i32
    %c0_i32_0 = arith.constant 0 : i32
    %c0_i32_1 = arith.constant 0 : i32
    return %c0_i32, %c0_i32_0 : i32, i32
  }
  func.func @transform_14(%arg0: i32) -> (i32, i32) {
    %c0_i32 = arith.constant 0 : i32
    %c0_i32_0 = arith.constant 0 : i32
    %c0_i32_1 = arith.constant 0 : i32
    return %c0_i32, %c0_i32_0 : i32, i32
  }
  func.func @transform_15(%arg0: i32) -> (i32, i32) {
    %c0_i32 = arith.constant 0 : i32
    %c0_i32_0 = arith.constant 0 : i32
    %c0_i32_1 = arith.constant 0 : i32
    return %c0_i32, %c0_i32_0 : i32, i32
  }
  func.func @transform_16(%arg0: i32) -> (i32, i32) {
    %c0_i32 = arith.constant 0 : i32
    %c0_i32_0 = arith.constant 0 : i32
    %c0_i32_1 = arith.constant 0 : i32
    return %c0_i32, %c0_i32_0 : i32, i32
  }
  func.func @transform_17(%arg0: i32) -> (i32, i32) {
    %c0_i32 = arith.constant 0 : i32
    %c0_i32_0 = arith.constant 0 : i32
    %c0_i32_1 = arith.constant 0 : i32
    return %c0_i32, %c0_i32_0 : i32, i32
  }
  func.func @transform_18(%arg0: i32) -> (i32, i32) {
    %c0_i32 = arith.constant 0 : i32
    %c0_i32_0 = arith.constant 0 : i32
    %c0_i32_1 = arith.constant 0 : i32
    return %c0_i32, %c0_i32_0 : i32, i32
  }
  func.func @transform_19(%arg0: i32) -> (i32, i32, i32) {
    %c0_i32 = arith.constant 0 : i32
    %c0_i32_0 = arith.constant 0 : i32
    %c0_i32_1 = arith.constant 0 : i32
    return %arg0, %c0_i32, %c0_i32_0 : i32, i32, i32
  }
  func.func @transform_20(%arg0: i32) -> (i32, i32, i32) {
    %c0_i32 = arith.constant 0 : i32
    %c0_i32_0 = arith.constant 0 : i32
    %c0_i32_1 = arith.constant 0 : i32
    return %arg0, %c0_i32, %c0_i32_0 : i32, i32, i32
  }
}

</mosaic_0001>

<bundles_post_ra>
// kernel: wdcnn3_forward.1
= control target key start
LH: loop header
LB: loop body
LE: loop exit
PB: predicated region body
PF: predicated region fallthrough
CT: control target
= control target key end

     0   :  { %s2796_s0 = inlined_call_operand.vmem [shape: f32[2,61,128], index: 0, kind: input, shape index: {}]   ;;  %s2797_s1 = inlined_call_operand.vmem [shape: f32[128,16], index: 1, kind: input, shape index: {}]   ;;  %s2798_s2 = inlined_call_operand.vmem [shape: f32[1,16], index: 2, kind: input, shape index: {}]   ;;  %s2799_s3 = inlined_call_operand.vmem [shape: f32[3,16,32], index: 3, kind: input, shape index: {}]   ;;  %s2800_s4 = inlined_call_operand.vmem [shape: f32[1,32], index: 4, kind: input, shape index: {}]   ;;  %s2801_s5 = inlined_call_operand.vmem [shape: f32[2,32,64], index: 5, kind: input, shape index: {}]   ;;  %s2802_s6 = inlined_call_operand.vmem [shape: f32[1,64], index: 6, kind: input, shape index: {}]   ;;  %s2803_s7 = inlined_call_operand.vmem [shape: f32[3,64,64], index: 7, kind: input, shape index: {}]   ;;  %s2804_s8 = inlined_call_operand.vmem [shape: f32[1,64], index: 8, kind: input, shape index: {}]   ;;  %s2805_s9 = inlined_call_operand.vmem [shape: f32[3,64,64], index: 9, kind: input, shape index: {}]   ;;  %s2806_s10 = inlined_call_operand.vmem [shape: f32[1,64], index: 10, kind: input, shape index: {}]   ;;  %s2807_s11 = inlined_call_operand.vmem [shape: f32[64,100], index: 11, kind: input, shape index: {}]   ;;  %s2808_s12 = inlined_call_operand.vmem [shape: f32[1,100], index: 12, kind: input, shape index: {}]   ;;  %s2809_s13 = inlined_call_operand.vmem [shape: f32[100,100], index: 13, kind: input, shape index: {}]   ;;  %s2810_s14 = inlined_call_operand.vmem [shape: f32[1,100], index: 14, kind: input, shape index: {}]   ;;  %s2811_s15 = inlined_call_operand.vmem [shape: f32[100,104], index: 15, kind: input, shape index: {}]   ;;  %s2812_s16 = inlined_call_operand.vmem [shape: f32[1,104], index: 16, kind: input, shape index: {}]   ;;  %s2813_s17 = inlined_call_operand.vmem [shape: f32[100,2], index: 17, kind: input, shape index: {}]   ;;  %s2814_s18 = inlined_call_operand.vmem [shape: f32[1,2], index: 18, kind: input, shape index: {}]   ;;  %s2815_s19 = inlined_call_operand.hbm [shape: f32[2,1,4], index: 19, kind: output, shape index: {0}]   ;;  %s2816_s20 = inlined_call_operand.hbm [shape: f32[2,1,2], index: 20, kind: output, shape index: {1}]  }
   0x1   :  { %2830 = sst [smem:[#allocation19_spill]] %s2796_s0 }
   0x2   :  { %2831 = sst [smem:[#allocation20_spill]] %s2797_s1 }
   0x3   :  { %2832 = sst [smem:[#allocation21_spill]] %s2798_s2 }
   0x4   :  { %2833 = sst [smem:[#allocation22_spill]] %s2799_s3 }
   0x5   :  { %2834 = sst [smem:[#allocation23_spill]] %s2800_s4 }
   0x6   :  { %2835 = sst [smem:[#allocation24_spill]] %s2801_s5 }
   0x7   :  { %2836 = sst [smem:[#allocation25_spill]] %s2802_s6 }
   0x8   :  { %2837 = sst [smem:[#allocation26_spill]] %s2815_s19 }
   0x9   :  { %2838 = sst [smem:[#allocation27_spill]] %s2816_s20 }
   0xa   :  { %26 = vsyncpa [#allocation7], 0 }
   0xb   :  { %28 = vsyncpa [#allocation7 + $0x1], 0 }
   0xc   :  { %29 = vsyncpa [#allocation9], 0 }
   0xd   :  { %31 = vsyncpa [#allocation9 + $0x1], 0  ;;  %s2193_s1 = smov 0   ;;  %s2195_s22 = smov 0  }
   0xe   :  { %s2197_s23 = smov 0   ;;  %s2199_s24 = smov 0  }
   0xf LB: > { %2839 = sst [smem:[#allocation12_spill]] %s2072_s1  ;;  %s2214_s2 = sadd.s32 4294967295, %s2084_s24   ;;  %s2084_s24 = sphi %s2199_s24, %s2863_s24   ;;  %s2080_s23 = sphi %s2197_s23, %s2865_s23   ;;  %s2076_s22 = sphi %s2195_s22, %s2867_s22   ;;  %s2072_s1 = sphi %s2193_s1, %s2866_s1  }
  0x10   : > { %2840 = sst [smem:[#allocation13_spill]] %s2080_s23  ;;  %s1821_s25 = sadd.s32 4294967294, %s2084_s24  }
  0x11   : > { %2841 = sst [smem:[#allocation14_spill]] %s2084_s24  ;;  %s2218_s3 = sadd.s32 1, %s2084_s24  }
  0x12   : > { %2842 = sst [smem:[#allocation15_spill]] %s2218_s3  ;;  %s448_s26 = sadd.s32 1, %s2080_s23 }
  0x13   : > { %s445_s27 = ssub.s32 %s2084_s24, %s2218_s3  ;;  %p458_p0 = scmp.ne.s32.totalorder %s2080_s23, %s2076_s22 }
  0x14   : > { %p446_p1 = scmp.eq.s32.totalorder %s445_s27, 0  ;;  %p459_p2 = scmp.eq.s32.totalorder %s2214_s2, 1 }
  0x15   : > { %p464_p3 = scmp.ne.s32.totalorder %s2076_s22, %s2072_s1  ;;  %p465_p4 = scmp.eq.s32.totalorder %s1821_s25, 1 }
  0x16   : > { %s2229_s28 = scalar_select %p446_p1, %s2080_s23, %s448_s26  }
  0x17   : > { %p2231_p5 = por %p459_p2, %p458_p0  ;;  %p2235_p6 = por %p465_p4, %p464_p3 }
  0x18   : > { %2843 = sst [smem:[#allocation16_spill]] %s2229_s28  ;;  %p1824_p7 = scmp.ge.s32.totalorder %s2084_s24, 1 }
  0x19   : > { %s2844_s4 = scalar_select %p2231_p5, 1, 0 }
  0x1a   : > { %s2846_s29 = scalar_select %p2235_p6, 1, 0 }
  0x1b   : > { %2845 = sst [smem:[#allocation17_spill]] %s2844_s4  ;;  %p571_p8 = scmp.lt.s32.totalorder %s2084_s24, 3 }
  0x1c   : > { %2847 = sst [smem:[#allocation18_spill]] %s2846_s29 }
  0x1d   : > { %p572_p9 = pnand %p1824_p7, %p571_p8 }
  0x1e   : > { %s2848_s21 = sld [smem:[#allocation20_spill]] (!%p572_p9)  ;;  %p632_p10 = scmp.lt.s32.totalorder (!%p572_p9), %s2214_s2, 1 }
  0x1f   : > { %575 = sbr.rel (%p572_p9) target bundleno = 2530 (0x9e2), region = 96  ;;  %s2849_s28 = sld [smem:[#allocation19_spill]] (!%p572_p9) }
  0x20   : > { %s2850_s24 = sld [smem:[#allocation21_spill]] (!%p572_p9)  ;;  %s2087_s4 = smov (!%p572_p9), 124  }
  0x21   : > { %s2851_s23 = sld [smem:[#allocation22_spill]] (!%p572_p9) }
  0x22   : > { %s2854_s5 = sld [smem:[#allocation24_spill]] (!%p572_p9) }
  0x23   : > { %s2855_s6 = sld [smem:[#allocation25_spill]] (!%p572_p9) }
  0x24   : > { %v660_v0 = vld [vmem:[%s2848_s21 + $0x78] sm:$0xff]  ;;  %v659_v1 = vld [vmem:[%s2848_s21 + $0x70] sm:$0xff]  ;;  %v658_v2 = vld [vmem:[%s2848_s21 + $0x68] sm:$0xff]  ;;  %s633_s27 = scalar_select %p632_p10, %s2214_s2, 1  ;;  %v714_v31 = vlaneseq  ;;  %vm766_vm0 = vcmask 1044480   ;;  %v2086_v56 = vmov 0.0  }
  0x25   : > { %665 = vmatpush.msra.mxu0 %v660_v0  ;;  %v657_v3 = vld [vmem:[%s2848_s21 + $0x60] sm:$0xff]  ;;  %v656_v4 = vld [vmem:[%s2848_s21 + $0x58] sm:$0xff]  ;;  %v655_v5 = vld [vmem:[%s2848_s21 + $0x50] sm:$0xff]  ;;  %vm753_vm3 = vcmask 498688   ;;  %vm844_vm10 = vcmask 130048   ;;  %vm852_vm11 = vcmask 128000  }
  0x26   : > { %v654_v6 = vld [vmem:[%s2848_s21 + $0x48] sm:$0xff]  ;;  %v653_v7 = vld [vmem:[%s2848_s21 + $0x40] sm:$0xff]  ;;  %v652_v8 = vld [vmem:[%s2848_s21 + $0x38] sm:$0xff]  ;;  %s1930_s1 = sshll.u32 %s633_s27, 6  ;;  %v715_v36 = vshrl.u32 %v714_v31, 7  ;;  %v720_v46 = vand.u32 127, %v714_v31 }
  0x27   : > { %666 = vmatpush.msra.mxu0 %v659_v1  ;;  %v651_v9 = vld [vmem:[%s2848_s21 + $0x30] sm:$0xff]  ;;  %v650_v10 = vld [vmem:[%s2848_s21 + $0x28] sm:$0xff]  ;;  %v649_v11 = vld [vmem:[%s2848_s21 + $0x20] sm:$0xff]  ;;  %s636_s25 = scalar_lea.vmem %s2849_s28, %s1930_s1  ;;  %845 = vst.msk [vmem:[#allocation2] sm:$0xff] %vm844_vm10, %v2086_v56  ;;  %s2852_s3 = smov %s2851_s23  ;;  %vm1018_vm12 = vcmask 1045504   ;;  %vm1013_vm13 = vcmask 244736  }
  0x28   : > { %v648_v12 = vld [vmem:[%s2848_s21 + $0x18] sm:$0xff]  ;;  %v647_v13 = vld [vmem:[%s2848_s21 + $0x10] sm:$0xff]  ;;  %v646_v14 = vld [vmem:[%s2848_s21 + $0x8] sm:$0xff]  ;;  %v721_v41 = vmul.u32 2, %v715_v36  ;;  %v716_v48 = vadd.s32 8, %v715_v36  ;;  %v717_v60 = vadd.s32 16, %v715_v36 }
  0x29   : > { %667 = vmatpush.msra.mxu0 %v658_v2  ;;  %v645_v15 = vld [vmem:[%s2848_s21] sm:$0xff]  ;;  %v638_v17 = vld [vmem:[%s636_s25 + $0x8] sm:$0xff]  ;;  %v639_v18 = vld [vmem:[%s636_s25 + $0x10] sm:$0xff]  ;;  %v718_v1 = vadd.s32 24, %v715_v36  ;;  %846 = vst.msk [vmem:[#allocation2 + $0x8] sm:$0xff] %vm844_vm10, %v2086_v56  ;;  %vm1074_vm14 = vcmask 261120  }
  0x2a   : > { %v637_v16 = vld [vmem:[%s636_s25] sm:$0xff]  ;;  %v640_v19 = vld [vmem:[%s636_s25 + $0x18] sm:$0xff]  ;;  %v642_v21 = vld [vmem:[%s636_s25 + $0x28] sm:$0xff]  ;;  %v737_v47 = vadd.s32 1, %v721_v41  ;;  %vm725_vm2 = vcmp.eq.s32.totalorder %v720_v46, %v721_v41  ;;  %v722_v53 = vmul.u32 2, %v716_v48  ;;  %v723_v61 = vmul.u32 2, %v717_v60 }
  0x2b   : > { %668 = vmatpush.msra.mxu0 %v657_v3  ;;  %v641_v20 = vld [vmem:[%s636_s25 + $0x20] sm:$0xff]  ;;  %v643_v22 = vld [vmem:[%s636_s25 + $0x30] sm:$0xff]  ;;  %v644_v23 = vld [vmem:[%s636_s25 + $0x38] sm:$0x1f]  ;;  %v2301_v58 = vsel %vm725_vm2, 1.0, %v2086_v56  ;;  %v724_v2 = vmul.u32 2, %v718_v1 }
  0x2c   : > { %v1977_v32 = vld [vmem:[%s2850_s24] ss:$0 sm:$0xff]  ;;  %vm741_vm1 = vcmp.eq.s32.totalorder %v720_v46, %v737_v47  ;;  %v738_v59 = vadd.s32 1, %v722_v53  ;;  %vm726_vm5 = vcmp.eq.s32.totalorder %v720_v46, %v722_v53  ;;  %v739_v0 = vadd.s32 1, %v723_v61  ;;  %847 = vst.msk [vmem:[#allocation2 + $0x10] sm:$0xff] %vm844_vm10, %v2086_v56  ;;  %s2742_s1 = sand.u32 1, %s2076_s22  }
  0x2d   : > { %669 = vmatpush.msra.mxu0 %v656_v4  ;;  %v2298_v57 = vsel %vm741_vm1, 1.0, %v2086_v56  ;;  %v2311_v63 = vsel %vm726_vm5, 1.0, %v2086_v56  ;;  %vm727_vm7 = vcmp.eq.s32.totalorder %v720_v46, %v723_v61  ;;  %vm728_vm9 = vcmp.eq.s32.totalorder %v720_v46, %v724_v2  ;;  %848 = vst.msk [vmem:[#allocation2 + $0x18] sm:$0xff] %vm844_vm10, %v2086_v56  ;;  %s2856_s30 = sld [smem:[#allocation26_spill]]  ;;  %s625_s25 = scalar_lea.vmem [#allocation6], %s2742_s1 }
  0x2e   : > { %vm742_vm4 = vcmp.eq.s32.totalorder %v720_v46, %v738_v59  ;;  %vm743_vm6 = vcmp.eq.s32.totalorder %v720_v46, %v739_v0  ;;  %v1829_v4 = vsel %vm727_vm7, 1.0, %v2086_v56  ;;  %1075 = vst.msk [vmem:[#allocation3] sm:$0xff] %vm1074_vm14, %v2086_v56  ;;  %vm1077_vm15 = vcmask 253952   ;;  %s1723_s19 = sshll.u32 %s625_s25, 4  ;;  %s1709_s24 = scalar_lea.sflag [#allocation7], %s2742_s1  ;;  %s1724_s19 = int_to_ptr.vmem [resolvable:$true] %s1723_s19 }
  0x2f   : > { %670 = vmatpush.msra.mxu0 %v655_v5  ;;  %v2308_v62 = vsel %vm742_vm4, 1.0, %v2086_v56  ;;  %v1833_v3 = vsel %vm743_vm6, 1.0, %v2086_v56  ;;  %v740_v5 = vadd.s32 1, %v724_v2  ;;  %1076 = vst.msk [vmem:[#allocation3 + $0x8] sm:$0xff] %vm1074_vm14, %v2086_v56  ;;  %vm1206_vm1 = vcmask 523264  }
  0x30   : > { %1078 = vst.msk [vmem:[#allocation3 + $0x10] sm:$0x1] %vm1077_vm15, %v2086_v56  ;;  %vm1208_vm2 = vcmask 517120   ;;  %vm1362_vm4 = vcmask 519168   ;;  %vm1472_vm5 = vcmask 1041408   ;;  %vm1469_vm6 = vcmask 15360  }
  0x31   : > { %671 = vmatpush.msra.mxu0 %v654_v6  ;;  %vm744_vm8 = vcmp.eq.s32.totalorder %v720_v46, %v740_v5  ;;  %1207 = vst.msk [vmem:[#allocation4] sm:$0xff] %vm1206_vm1, %v2086_v56  ;;  %vm1570_vm7 = vcmask 1043456  }
  0x32   : > { %v1834_v6 = vsel %vm744_vm8, 1.0, %v2086_v56  ;;  %1209 = vst.msk [vmem:[#allocation4 + $0x8] sm:$0x3] %vm1208_vm2, %v2086_v56  ;;  %vm1566_vm8 = vcmask 818176  }
  0x33   : > { %672 = vmatpush.msra.mxu0 %v653_v7  ;;  %v1830_v7 = vsel %vm728_vm9, 1.0, %v2086_v56  ;;  %v1879_v56 = vld [vmem:[%s2803_s7 + $0x50] sm:$0xff]  ;;  %s1721_s0 = scalar_lea.hbm %s2856_s30, %s2214_s2  ;;  %s2010_s26 = scalar_lea.hbm %s2856_s30, 2 }
  0x34   : > { %s1725_s20 = sshll.u32 %s1721_s0, 4  ;;  %s1726_s20 = int_to_ptr.hbm [resolvable:$true] %s1725_s20 }
  0x35   : > { %673 = vmatpush.msra.mxu0 %v652_v8  ;;  %v1846_v8 = vld [vmem:[%s2851_s23 + $0x18] sm:$0xff]  ;;  %s2853_s23 = sld [smem:[#allocation23_spill]] }
  0x36   : > { %893 = vmatpush.msra.mxu3 %v1846_v8  ;;  %v1870_v8 = vld [vmem:[%s2854_s5 + $0x38] sm:$0xff] }
  0x37   : > { %674 = vmatpush.msra.mxu0 %v651_v9  ;;  %v1845_v9 = vld [vmem:[%s2852_s3 + $0x10] sm:$0xff] }
  0x38   : > { %894 = vmatpush.msra.mxu3 %v1845_v9  ;;  %v1087_v9 = vld [vmem:[%s2854_s5 + $0x18] sm:$0xff] }
  0x39   : > { %675 = vmatpush.msra.mxu0 %v650_v10  ;;  %v1856_v10 = vld [vmem:[%s2852_s3 + $0x28] sm:$0xff] }
  0x3b   : > { %676 = vmatpush.msra.mxu0 %v649_v11  ;;  %v1855_v11 = vld [vmem:[%s2852_s3 + $0x20] sm:$0xff] }
  0x3c   : > { %v1978_v60 = vld [vmem:[%s2853_s23] ss:$0 sm:$0xff] }
  0x3d   : > { %677 = vmatpush.msra.mxu0 %v648_v12 }
  0x3f   : > { %678 = vmatpush.msra.mxu0 %v647_v13 }
  0x41   : > { %679 = vmatpush.msra.mxu0 %v646_v14 }
  0x43   : > { %680 = vmatpush.msra.mxu0 %v645_v15 }
  0x44   : > { %681 = vmatmul.f32.vlgmr.msra.gmra.mxu0 %v637_v16  ;;  %v859_v16 = vld [vmem:[%s2852_s3 + $0x8] sm:$0xff] }
  0x45   : > { %934 = vmatpush.msrb.mxu3 %v859_v16 }
  0x4c   : > { %684 = vmatmul.f32.gmra.mxu0 %v638_v17  ;;  %v858_v17 = vld [vmem:[%s2852_s3] sm:$0xff] }
  0x4d   : > { %935 = vmatpush.msrb.mxu3 %v858_v17 }
  0x54   : > { %687 = vmatmul.f32.gmra.mxu0 %v639_v18 }
  0x5c   : > { %690 = vmatmul.f32.gmra.mxu0 %v640_v19 }
  0x64   : > { %693 = vmatmul.f32.gmra.mxu0 %v641_v20 }
  0x6c   : > { %696 = vmatmul.f32.gmra.mxu0 %v642_v21 }
  0x74   : > { %699 = vmatmul.f32.gmra.mxu0 %v643_v22 }
  0x7c   : > { %702 = vmatmul.f32.gmra.mxu0 %v644_v23 }
  0xc1   : > { %v682_v24 = vpop.f32.mrf.mxu0 }
  0xc2   : > { %v683_v51 = vadd.f32 %v1977_v32, %v682_v24 }
  0xc4   : > { %v706_v55 = vmax.f32 %v683_v51, 0.0 }
  0xc9   : > { %v685_v25 = vpop.f32.mrf.mxu0 }
  0xca   : > { %v686_v49 = vadd.f32 %v1977_v32, %v685_v25 }
  0xcc   : > { %v707_v54 = vmax.f32 %v686_v49, 0.0 }
  0xd1   : > { %v688_v26 = vpop.f32.mrf.mxu0 }
  0xd2   : > { %v689_v44 = vadd.f32 %v1977_v32, %v688_v26 }
  0xd4   : > { %v708_v52 = vmax.f32 %v689_v44, 0.0 }
  0xd9   : > { %v691_v27 = vpop.f32.mrf.mxu0 }
  0xda   : > { %v692_v42 = vadd.f32 %v1977_v32, %v691_v27 }
  0xdc   : > { %v709_v50 = vmax.f32 %v692_v42, 0.0 }
  0xe1   : > { %v694_v28 = vpop.f32.mrf.mxu0 }
  0xe2   : > { %v695_v39 = vadd.f32 %v1977_v32, %v694_v28 }
  0xe4   : > { %v710_v45 = vmax.f32 %v695_v39, 0.0 }
  0xe9   : > { %v697_v29 = vpop.f32.mrf.mxu0 }
  0xea   : > { %v698_v37 = vadd.f32 %v1977_v32, %v697_v29 }
  0xec   : > { %v711_v43 = vmax.f32 %v698_v37, 0.0 }
  0xf1   : > { %v700_v30 = vpop.f32.mrf.mxu0 }
  0xf2   : > { %v701_v34 = vadd.f32 %v1977_v32, %v700_v30 }
  0xf4   : > { %v712_v40 = vmax.f32 %v701_v34, 0.0 }
  0xf9   : > { %v703_v33 = vpop.f32.mrf.mxu0 }
  0xfa   : > { %v704_v35 = vadd.f32 %v1977_v32, %v703_v33 }
  0xfc   : > { %v713_v38 = vmax.f32 %v704_v35, 0.0 }
  0xfe   : > { %1835 = vmatpush.msk.msra.mxu1 %vm766_vm0, %v713_v38  ;;  %1840 = vmatpush.msk.msra.mxu2 %vm766_vm0, %v713_v38  ;;  %vm1080_vm0 = vcmask 260096  }
 0x100   : > { %779 = vmatpush.msra.mxu1 %v712_v40  ;;  %820 = vmatpush.msra.mxu2 %v712_v40 }
 0x102   : > { %780 = vmatpush.msra.mxu1 %v711_v43  ;;  %821 = vmatpush.msra.mxu2 %v711_v43 }
 0x104   : > { %781 = vmatpush.msra.mxu1 %v710_v45  ;;  %822 = vmatpush.msra.mxu2 %v710_v45 }
 0x106   : > { %782 = vmatpush.msra.mxu1 %v709_v50  ;;  %823 = vmatpush.msra.mxu2 %v709_v50 }
 0x108   : > { %783 = vmatpush.msra.mxu1 %v708_v52  ;;  %824 = vmatpush.msra.mxu2 %v708_v52 }
 0x10a   : > { %784 = vmatpush.msra.mxu1 %v707_v54  ;;  %825 = vmatpush.msra.mxu2 %v707_v54 }
 0x10c   : > { %785 = vmatpush.msra.mxu1 %v706_v55  ;;  %826 = vmatpush.msra.mxu2 %v706_v55 }
 0x10d   : > { %1841 = vmatmul.msk.f32.vlgmr.msra.gmra.mxu2 %vm753_vm3, %v2298_v57  ;;  %1836 = vmatmul.msk.f32.vlgmr.msra.gmra.mxu1 %vm753_vm3, %v2301_v58 }
 0x10e   : > { %982 = vmatpush.msrb.mxu1 %v1856_v10  ;;  %v1869_v10 = vld [vmem:[%s2854_s5 + $0x30] sm:$0xff] }
 0x110   : > { %983 = vmatpush.msrb.mxu1 %v1855_v11  ;;  %v1085_v11 = vld [vmem:[%s2854_s5 + $0x8] sm:$0xff] }
 0x112   : > { %1142 = vmatpush.msra.mxu1 %v1087_v9 }
 0x115   : > { %1842 = vmatmul.msk.f32.gmra.mxu2 %vm753_vm3, %v2308_v62  ;;  %1837 = vmatmul.msk.f32.gmra.mxu1 %vm753_vm3, %v2311_v63 }
 0x11d   : > { %1843 = vmatmul.msk.f32.gmra.mxu2 %vm753_vm3, %v1833_v3  ;;  %1838 = vmatmul.msk.f32.gmra.mxu1 %vm753_vm3, %v1829_v4 }
 0x125   : > { %1844 = vmatmul.msk.f32.gmra.mxu2 %vm753_vm3, %v1834_v6  ;;  %1839 = vmatmul.msk.f32.gmra.mxu1 %vm753_vm3, %v1830_v7  ;;  %vm1316_vm3 = vcmask 64512  }
 0x18a   : > { %v787_v12 = vpop.f32.mrf.mxu1 }
 0x190   : > { %v828_v13 = vpop.f32.mrf.mxu2 }
 0x191   : > { %v840_v14 = vmax.f32 %v787_v12, %v828_v13  ;;  %v1867_v12 = vld [vmem:[%s2854_s5 + $0x20] sm:$0xff] }
 0x192   : > { %v790_v15 = vpop.f32.mrf.mxu1  ;;  %v1084_v13 = vld [vmem:[%s2854_s5] sm:$0xff] }
 0x193   : > { %849 = vst.msk [vmem:[#allocation2 + $0x1] sm:$0xff] %vm844_vm10, %v840_v14 }
 0x198   : > { %v831_v18 = vpop.f32.mrf.mxu2 }
 0x199   : > { %v841_v19 = vmax.f32 %v790_v15, %v831_v18 }
 0x19a   : > { %v860_v20 = vld [vmem:[#allocation2 + $0x1] sm:$0xff]  ;;  %v793_v21 = vpop.f32.mrf.mxu1 }
 0x19b   : > { %850 = vst.msk [vmem:[#allocation2 + $0x9] sm:$0xff] %vm844_vm10, %v841_v19  ;;  %1847 = vmatmul.msk.f32.vlgmr.msra.gmra.mxu3 %vm844_vm10, %v860_v20  ;;  %v854_v33 = vld [vmem:[#allocation2] sm:$0xff] }
 0x19c   : > { %1113 = vmatpush.msra.mxu3 %v1870_v8 }
 0x19e   : > { %1114 = vmatpush.msra.mxu3 %v1869_v10  ;;  %v1980_v10 = vld [vmem:[%s2804_s8] ss:$0 sm:$0xff] }
 0x1a0   : > { %v834_v22 = vpop.f32.mrf.mxu2 }
 0x1a1   : > { %v842_v23 = vmax.f32 %v793_v21, %v834_v22 }
 0x1a2   : > { %v861_v24 = vld [vmem:[#allocation2 + $0x9] sm:$0xff]  ;;  %v796_v26 = vpop.f32.mrf.mxu1 }
 0x1a3   : > { %v949_v25 = vld [vmem:[#allocation2 + $0x2] sm:$0xff]  ;;  %851 = vst.msk [vmem:[#allocation2 + $0x11] sm:$0xff] %vm844_vm10, %v842_v23  ;;  %1848 = vmatmul.msk.f32.gmra.mxu3 %vm844_vm10, %v861_v24  ;;  %v1884_v24 = vld [vmem:[%s2803_s7 + $0x78] sm:$0xff] }
 0x1a4   : > { %1857 = vmatmul.msk.f32.vlgmr.msrb.gmra.mxu1 %vm844_vm10, %v949_v25  ;;  %v855_v35 = vld [vmem:[#allocation2 + $0x8] sm:$0xff]  ;;  %v1883_v25 = vld [vmem:[%s2803_s7 + $0x70] sm:$0xff]  ;;  %1241 = vmatpush.msrb.mxu0 %v1884_v24  ;;  %v1901_v24 = vld [vmem:[%s2805_s9 + $0x58] sm:$0xff] }
 0x1a6   : > { %1242 = vmatpush.msrb.mxu0 %v1883_v25  ;;  %v1910_v25 = vld [vmem:[%s2805_s9 + $0x90] sm:$0xff] }
 0x1a8   : > { %v837_v27 = vpop.f32.mrf.mxu2 }
 0x1a9   : > { %v843_v28 = vmax.f32 %v796_v26, %v837_v27  ;;  %v1882_v26 = vld [vmem:[%s2803_s7 + $0x68] sm:$0xff] }
 0x1aa   : > { %v862_v29 = vld [vmem:[#allocation2 + $0x11] sm:$0xff]  ;;  %1243 = vmatpush.msrb.mxu0 %v1882_v26 }
 0x1ab   : > { %v950_v30 = vld [vmem:[#allocation2 + $0xa] sm:$0xff]  ;;  %853 = vst.msk [vmem:[#allocation2 + $0x19] sm:$0x3f] %vm852_vm11, %v843_v28  ;;  %1849 = vmatmul.msk.f32.gmra.mxu3 %vm844_vm10, %v862_v29  ;;  %v1368_v26 = vld [vmem:[%s2805_s9 + $0x18] sm:$0xff]  ;;  %vm1694_vm11 = vcmask 8192  }
 0x1ac   : > { %1858 = vmatmul.msk.f32.gmra.mxu1 %vm844_vm10, %v950_v30  ;;  %v856_v36 = vld [vmem:[#allocation2 + $0x10] sm:$0xff]  ;;  %v1979_v30 = vld [vmem:[%s2855_s6] ss:$0 sm:$0xff] }
 0x1b2   : > { %v863_v31 = vld [vmem:[#allocation2 + $0x19] sm:$0x3f] }
 0x1b3   : > { %v951_v32 = vld [vmem:[#allocation2 + $0x12] sm:$0xff]  ;;  %1850 = vmatmul.msk.f32.gmra.mxu3 %vm844_vm10, %v863_v31  ;;  %v952_v34 = vld [vmem:[#allocation2 + $0x1a] sm:$0x3f] }
 0x1b4   : > { %1859 = vmatmul.msk.f32.gmra.mxu1 %vm844_vm10, %v951_v32  ;;  %v857_v37 = vld [vmem:[#allocation2 + $0x18] sm:$0x3f] }
 0x1bb   : > { %1851 = vmatmul.msk.f32.vlgmr.msrb.gmra.mxu3 %vm844_vm10, %v854_v33 }
 0x1bc   : > { %1860 = vmatmul.msk.f32.gmra.mxu1 %vm844_vm10, %v952_v34 }
 0x1c3   : > { %1852 = vmatmul.msk.f32.gmra.mxu3 %vm844_vm10, %v855_v35 }
 0x1cb   : > { %1853 = vmatmul.msk.f32.gmra.mxu3 %vm844_vm10, %v856_v36 }
 0x1d3   : > { %1854 = vmatmul.msk.f32.gmra.mxu3 %vm844_vm10, %v857_v37 }
 0x21e   : > { %v896_v38 = vpop.f32.mrf.mxu3 }
 0x221   : > { %v985_v42 = vpop.f32.mrf.mxu1 }
 0x226   : > { %v899_v39 = vpop.f32.mrf.mxu3 }
 0x229   : > { %v988_v44 = vpop.f32.mrf.mxu1 }
 0x22e   : > { %v902_v40 = vpop.f32.mrf.mxu3 }
 0x231   : > { %v991_v46 = vpop.f32.mrf.mxu1 }
 0x236   : > { %v905_v41 = vpop.f32.mrf.mxu3 }
 0x239   : > { %v994_v54 = vpop.f32.mrf.mxu1 }
 0x23e   : > { %v937_v43 = vpop.f32.mrf.mxu3 }
 0x23f   : > { %v938_v51 = vadd.f32 %v937_v43, %v896_v38  ;;  %v1894_v38 = vld [vmem:[%s2803_s7 + $0xb8] sm:$0xff]  ;;  %v1217_v43 = vld [vmem:[%s2803_s7 + $0x28] sm:$0xff] }
 0x241   : > { %v997_v61 = vadd.f32 %v985_v42, %v938_v51  ;;  %v1892_v42 = vld [vmem:[%s2803_s7 + $0xa8] sm:$0xff]  ;;  %v1214_v51 = vld [vmem:[%s2803_s7 + $0x10] sm:$0xff] }
 0x243   : > { %v1005_v5 = vadd.f32 %v1978_v60, %v997_v61 }
 0x245   : > { %v1009_v7 = vmax.f32 %v1005_v5, 0.0  ;;  %v1915_v5 = vld [vmem:[%s2805_s9 + $0xb8] sm:$0xff] }
 0x246   : > { %v940_v45 = vpop.f32.mrf.mxu3 }
 0x247   : > { %v941_v49 = vadd.f32 %v940_v45, %v899_v39  ;;  %v1893_v39 = vld [vmem:[%s2803_s7 + $0xb0] sm:$0xff]  ;;  %v1891_v45 = vld [vmem:[%s2803_s7 + $0xa0] sm:$0xff] }
 0x249   : > { %v998_v55 = vadd.f32 %v988_v44, %v941_v49  ;;  %v1881_v44 = vld [vmem:[%s2803_s7 + $0x60] sm:$0xff]  ;;  %v1889_v49 = vld [vmem:[%s2803_s7 + $0x90] sm:$0xff] }
 0x24a   : > { %1244 = vmatpush.msrb.mxu0 %v1881_v44 }
 0x24b   : > { %v1006_v3 = vadd.f32 %v1978_v60, %v998_v55  ;;  %v1213_v55 = vld [vmem:[%s2803_s7 + $0x8] sm:$0xff] }
 0x24d   : > { %v1010_v6 = vmax.f32 %v1006_v3, 0.0 }
 0x24e   : > { %v943_v47 = vpop.f32.mrf.mxu3 }
 0x24f   : > { %v944_v48 = vadd.f32 %v943_v47, %v902_v40  ;;  %v1219_v40 = vld [vmem:[%s2803_s7 + $0x38] sm:$0xff] }
 0x250   : > { %v1890_v47 = vld [vmem:[%s2803_s7 + $0x98] sm:$0xff] }
 0x251   : > { %v999_v52 = vadd.f32 %v991_v46, %v944_v48  ;;  %v1216_v46 = vld [vmem:[%s2803_s7 + $0x20] sm:$0xff]  ;;  %v1880_v48 = vld [vmem:[%s2803_s7 + $0x58] sm:$0xff] }
 0x252   : > { %1245 = vmatpush.msrb.mxu0 %v1880_v48 }
 0x253   : > { %v1007_v1 = vadd.f32 %v1978_v60, %v999_v52  ;;  %v1888_v52 = vld [vmem:[%s2803_s7 + $0x88] sm:$0xff] }
 0x254   : > { %1246 = vmatpush.msrb.mxu0 %v1879_v56  ;;  %v1524_v56 = vld [vmem:[%s2807_s11 + $0x28] sm:$0xff] }
 0x255   : > { %v1011_v4 = vmax.f32 %v1007_v1, 0.0 }
 0x256   : > { %v946_v50 = vpop.f32.mrf.mxu3 }
 0x257   : > { %v947_v53 = vadd.f32 %v946_v50, %v905_v41  ;;  %v1218_v41 = vld [vmem:[%s2803_s7 + $0x30] sm:$0xff]  ;;  %v1215_v50 = vld [vmem:[%s2803_s7 + $0x18] sm:$0xff] }
 0x259   : > { %v1000_v59 = vadd.f32 %v994_v54, %v947_v53  ;;  %v1887_v53 = vld [vmem:[%s2803_s7 + $0x80] sm:$0xff]  ;;  %v1878_v54 = vld [vmem:[%s2803_s7 + $0x48] sm:$0xff] }
 0x25a   : > { %1247 = vmatpush.msrb.mxu0 %v1878_v54  ;;  %v1564_v54 = vld [vmem:[%s2809_s13 + $0x60] sm:$0xf] }
 0x25b   : > { %v1008_v0 = vadd.f32 %v1978_v60, %v1000_v59  ;;  %v1877_v59 = vld [vmem:[%s2803_s7 + $0x40] sm:$0xff] }
 0x25c   : > { %v1212_v60 = vld [vmem:[%s2803_s7] sm:$0xff]  ;;  %1248 = vmatpush.msrb.mxu0 %v1877_v59  ;;  %v1562_v59 = vld [vmem:[%s2809_s13 + $0x50] sm:$0xff] }
 0x25d   : > { %v1012_v2 = vmax.f32 %v1008_v0, 0.0 }
 0x25f   : > { %1861 = vmatpush.msk.msrb.mxu2 %vm1018_vm12, %v1012_v2 }
 0x261   : > { %1035 = vmatpush.msrb.mxu2 %v1011_v4 }
 0x263   : > { %1036 = vmatpush.msrb.mxu2 %v1010_v6 }
 0x265   : > { %1037 = vmatpush.msrb.mxu2 %v1009_v7 }
 0x266   : > { %1862 = vmatmul.msk.f32.vlgmr.msrb.gmra.mxu2 %vm1013_vm13, %v2301_v58 }
 0x267   : > { %1864 = vmatpush.msk.msra.mxu2 %vm1018_vm12, %v1012_v2 }
 0x269   : > { %1062 = vmatpush.msra.mxu2 %v1011_v4 }
 0x26b   : > { %1063 = vmatpush.msra.mxu2 %v1010_v6  ;;  %v1914_v6 = vld [vmem:[%s2805_s9 + $0xb0] sm:$0xff] }
 0x26d   : > { %1064 = vmatpush.msra.mxu2 %v1009_v7 }
 0x26e   : > { %1863 = vmatmul.msk.f32.gmra.mxu2 %vm1013_vm13, %v2311_v63  ;;  %v1086_v63 = vld [vmem:[%s2854_s5 + $0x10] sm:$0xff] }
 0x26f   : > { %1143 = vmatpush.msra.mxu1 %v1086_v63 }
 0x271   : > { %1144 = vmatpush.msra.mxu1 %v1085_v11 }
 0x273   : > { %1145 = vmatpush.msra.mxu1 %v1084_v13  ;;  %v1905_v13 = vld [vmem:[%s2805_s9 + $0x78] sm:$0xff] }
 0x275   : > { %1264 = vmatpush.msrb.mxu1 %v1219_v40 }
 0x276   : > { %1865 = vmatmul.msk.f32.vlgmr.msra.gmra.mxu2 %vm1013_vm13, %v2298_v57 }
 0x277   : > { %1265 = vmatpush.msrb.mxu1 %v1218_v41  ;;  %v1526_v41 = vld [vmem:[%s2807_s11 + $0x38] sm:$0xff] }
 0x279   : > { %1266 = vmatpush.msrb.mxu1 %v1217_v43 }
 0x27b   : > { %1267 = vmatpush.msrb.mxu1 %v1216_v46  ;;  %v1981_v46 = vld [vmem:[%s2806_s10] ss:$0 sm:$0xff] }
 0x27d   : > { %1268 = vmatpush.msrb.mxu1 %v1215_v50 }
 0x27e   : > { %1866 = vmatmul.msk.f32.gmra.mxu2 %vm1013_vm13, %v2308_v62  ;;  %v1868_v62 = vld [vmem:[%s2854_s5 + $0x28] sm:$0xff] }
 0x27f   : > { %1115 = vmatpush.msra.mxu3 %v1868_v62  ;;  %1269 = vmatpush.msrb.mxu1 %v1214_v51  ;;  %v1523_v51 = vld [vmem:[%s2807_s11 + $0x20] sm:$0xff] }
 0x281   : > { %1116 = vmatpush.msra.mxu3 %v1867_v12  ;;  %1270 = vmatpush.msrb.mxu1 %v1213_v55  ;;  %v1563_v55 = vld [vmem:[%s2809_s13 + $0x58] sm:$0xff] }
 0x283   : > { %1271 = vmatpush.msrb.mxu1 %v1212_v60  ;;  %v1561_v60 = vld [vmem:[%s2809_s13 + $0x48] sm:$0xff] }
 0x2e9   : > { %v1039_v14 = vpop.f32.mrf.mxu2 }
 0x2f1   : > { %v1042_v15 = vpop.f32.mrf.mxu2 }
 0x2f9   : > { %v1066_v16 = vpop.f32.mrf.mxu2 }
 0x2fa   : > { %v1072_v17 = vmax.f32 %v1039_v14, %v1066_v16  ;;  %v1372_v14 = vld [vmem:[%s2805_s9 + $0x38] sm:$0xff]  ;;  %v1371_v16 = vld [vmem:[%s2805_s9 + $0x30] sm:$0xff] }
 0x2fc   : > { %1079 = vst.msk [vmem:[#allocation3 + $0x1] sm:$0xff] %vm1074_vm14, %v1072_v17  ;;  %v1913_v17 = vld [vmem:[%s2805_s9 + $0xa8] sm:$0xff] }
 0x301   : > { %v1069_v18 = vpop.f32.mrf.mxu2 }
 0x302   : > { %v1073_v19 = vmax.f32 %v1042_v15, %v1069_v18  ;;  %v1904_v15 = vld [vmem:[%s2805_s9 + $0x70] sm:$0xff]  ;;  %v1903_v18 = vld [vmem:[%s2805_s9 + $0x68] sm:$0xff] }
 0x303   : > { %v1088_v20 = vld [vmem:[#allocation3 + $0x1] sm:$0xff] }
 0x304   : > { %v1082_v21 = vld [vmem:[#allocation3] sm:$0xff]  ;;  %1081 = vst.msk [vmem:[#allocation3 + $0x9] sm:$0x7f] %vm1080_vm0, %v1073_v19  ;;  %1871 = vmatmul.msk.f32.vlgmr.msra.gmra.mxu3 %vm1074_vm14, %v1088_v20  ;;  %v1370_v19 = vld [vmem:[%s2805_s9 + $0x28] sm:$0xff] }
 0x305   : > { %1873 = vmatmul.msk.f32.vlgmr.msra.gmra.mxu1 %vm1074_vm14, %v1082_v21  ;;  %v1912_v20 = vld [vmem:[%s2805_s9 + $0xa0] sm:$0xff] }
 0x306   : > { %1417 = vmatpush.msra.mxu1 %v1372_v14  ;;  %v1902_v21 = vld [vmem:[%s2805_s9 + $0x60] sm:$0xff]  ;;  %v1602_v14 = vld [vmem:[%s2811_s15 + $0x38] sm:$0xff] }
 0x308   : > { %1418 = vmatpush.msra.mxu1 %v1371_v16  ;;  %v1600_v16 = vld [vmem:[%s2811_s15 + $0x28] sm:$0xff] }
 0x30a   : > { %1419 = vmatpush.msra.mxu1 %v1370_v19  ;;  %v1527_v19 = vld [vmem:[%s2808_s12] sm:$0x1] }
 0x30b   : > { %v1089_v22 = vld [vmem:[#allocation3 + $0x9] sm:$0xff] }
 0x30c   : > { %v1083_v23 = vld [vmem:[#allocation3 + $0x8] sm:$0xff]  ;;  %1872 = vmatmul.msk.f32.gmra.mxu3 %vm1074_vm14, %v1089_v22  ;;  %v1369_v22 = vld [vmem:[%s2805_s9 + $0x20] sm:$0xff] }
 0x30d   : > { %1874 = vmatmul.msk.f32.gmra.mxu1 %vm1074_vm14, %v1083_v23  ;;  %v1911_v23 = vld [vmem:[%s2805_s9 + $0x98] sm:$0xff] }
 0x30e   : > { %1420 = vmatpush.msra.mxu1 %v1369_v22 }
 0x310   : > { %1421 = vmatpush.msra.mxu1 %v1368_v26  ;;  %v1565_v26 = vld [vmem:[%s2810_s14] sm:$0x1] }
 0x382   : > { %v1147_v27 = vpop.f32.mrf.mxu1 }
 0x387   : > { %v1118_v28 = vpop.f32.mrf.mxu3 }
 0x388   : > { %v1148_v29 = vadd.f32 %v1147_v27, %v1118_v28  ;;  %v1900_v27 = vld [vmem:[%s2805_s9 + $0x50] sm:$0xff] }
 0x389   : > { %v1367_v28 = vld [vmem:[%s2805_s9 + $0x10] sm:$0xff] }
 0x38a   : > { %v1150_v31 = vpop.f32.mrf.mxu1  ;;  %v1157_v34 = vadd.f32 %v1979_v30, %v1148_v29  ;;  %v1909_v29 = vld [vmem:[%s2805_s9 + $0x88] sm:$0xff]  ;;  %1422 = vmatpush.msra.mxu1 %v1367_v28 }
 0x38c   : > { %v1159_v37 = vmax.f32 %v1157_v34, 0.0  ;;  %v1365_v34 = vld [vmem:[%s2805_s9] sm:$0xff] }
 0x38f   : > { %v1121_v32 = vpop.f32.mrf.mxu3 }
 0x390   : > { %v1151_v33 = vadd.f32 %v1150_v31, %v1121_v32  ;;  %v1899_v31 = vld [vmem:[%s2805_s9 + $0x48] sm:$0xff] }
 0x391   : > { %v1366_v32 = vld [vmem:[%s2805_s9 + $0x8] sm:$0xff] }
 0x392   : > { %v1158_v35 = vadd.f32 %v1979_v30, %v1151_v33  ;;  %v1908_v30 = vld [vmem:[%s2805_s9 + $0x80] sm:$0xff]  ;;  %1423 = vmatpush.msra.mxu1 %v1366_v32 }
 0x393   : > { %v1898_v33 = vld [vmem:[%s2805_s9 + $0x40] sm:$0xff] }
 0x394   : > { %v1160_v36 = vmax.f32 %v1158_v35, 0.0  ;;  %1424 = vmatpush.msra.mxu1 %v1365_v34 }
 0x396   : > { %1177 = vmatpush.msrb.mxu2 %v1160_v36  ;;  %1199 = vmatpush.msrb.mxu3 %v1160_v36 }
 0x398   : > { %1178 = vmatpush.msrb.mxu2 %v1159_v37  ;;  %1200 = vmatpush.msrb.mxu3 %v1159_v37 }
 0x399   : > { %1875 = vmatmul.msk.f32.vlgmr.msrb.gmra.mxu2 %vm844_vm10, %v2301_v58  ;;  %1876 = vmatmul.msk.f32.vlgmr.msrb.gmra.mxu3 %vm844_vm10, %v2298_v57  ;;  %vm1680_vm10 = vcmask 24576  }
 0x39a   : > { %1297 = vmatpush.msra.mxu2 %v1894_v38 }
 0x39c   : > { %1298 = vmatpush.msra.mxu2 %v1893_v39 }
 0x39e   : > { %1299 = vmatpush.msra.mxu2 %v1892_v42  ;;  %v1525_v42 = vld [vmem:[%s2807_s11 + $0x30] sm:$0xff] }
 0x3a0   : > { %1300 = vmatpush.msra.mxu2 %v1891_v45 }
 0x3a2   : > { %1301 = vmatpush.msra.mxu2 %v1890_v47 }
 0x3a4   : > { %1302 = vmatpush.msra.mxu2 %v1889_v49 }
 0x3a6   : > { %1303 = vmatpush.msra.mxu2 %v1888_v52  ;;  %v1522_v52 = vld [vmem:[%s2807_s11 + $0x18] sm:$0xff] }
 0x3a8   : > { %1304 = vmatpush.msra.mxu2 %v1887_v53  ;;  %v1519_v53 = vld [vmem:[%s2807_s11] sm:$0xff] }
 0x3aa   : > { %1450 = vmatpush.msrb.mxu2 %v1915_v5 }
 0x3ac   : > { %1451 = vmatpush.msrb.mxu2 %v1914_v6 }
 0x3ae   : > { %1452 = vmatpush.msrb.mxu2 %v1913_v17  ;;  %v1599_v17 = vld [vmem:[%s2811_s15 + $0x20] sm:$0xff] }
 0x3b0   : > { %1453 = vmatpush.msrb.mxu2 %v1912_v20 }
 0x3b2   : > { %1454 = vmatpush.msrb.mxu2 %v1911_v23  ;;  %v1597_v23 = vld [vmem:[%s2811_s15 + $0x10] sm:$0xff] }
 0x3b4   : > { %1455 = vmatpush.msrb.mxu2 %v1910_v25  ;;  %v1595_v25 = vld [vmem:[%s2811_s15] sm:$0xff] }
 0x3b6   : > { %1456 = vmatpush.msrb.mxu2 %v1909_v29 }
 0x3b8   : > { %1457 = vmatpush.msrb.mxu2 %v1908_v30  ;;  %v1608_v30 = vld [vmem:[%s2812_s16] sm:$0x1] }
 0x41c   : > { %v1180_v61 = vpop.f32.mrf.mxu2  ;;  %v1202_v0 = vpop.f32.mrf.mxu3 }
 0x41d   : > { %v1205_v1 = vmax.f32 %v1180_v61, %v1202_v0  ;;  %v1560_v61 = vld [vmem:[%s2809_s13 + $0x40] sm:$0xff]  ;;  %v1559_v0 = vld [vmem:[%s2809_s13 + $0x38] sm:$0xff] }
 0x41f   : > { %1210 = vst.msk [vmem:[#allocation4 + $0x1] sm:$0xff] %vm1206_vm1, %v1205_v1  ;;  %v1558_v1 = vld [vmem:[%s2809_s13 + $0x30] sm:$0xff] }
 0x426   : > { %v1276_v2 = vld [vmem:[#allocation4 + $0x2] sm:$0xff] }
 0x427   : > { %v1220_v3 = vld [vmem:[#allocation4 + $0x1] sm:$0xff]  ;;  %1895 = vmatmul.msk.f32.vlgmr.msra.gmra.mxu2 %vm1206_vm1, %v1276_v2  ;;  %v1557_v2 = vld [vmem:[%s2809_s13 + $0x28] sm:$0xff] }
 0x428   : > { %v1211_v4 = vld [vmem:[#allocation4] sm:$0xff]  ;;  %1885 = vmatmul.msk.f32.vlgmr.msrb.gmra.mxu0 %vm1206_vm1, %v1220_v3  ;;  %v1556_v3 = vld [vmem:[%s2809_s13 + $0x20] sm:$0xff] }
 0x429   : > { %1886 = vmatmul.msk.f32.vlgmr.msrb.gmra.mxu1 %vm1206_vm1, %v1211_v4  ;;  %v1555_v4 = vld [vmem:[%s2809_s13 + $0x18] sm:$0xff] }
 0x42a   : > { %1922 = vmatpush.msk.msrb.mxu1 %vm1570_vm7, %v1564_v54 }
 0x42c   : > { %1578 = vmatpush.msrb.mxu1 %v1563_v55 }
 0x42e   : > { %1579 = vmatpush.msrb.mxu1 %v1562_v59 }
 0x430   : > { %1580 = vmatpush.msrb.mxu1 %v1561_v60 }
 0x432   : > { %1581 = vmatpush.msrb.mxu1 %v1560_v61 }
 0x434   : > { %1582 = vmatpush.msrb.mxu1 %v1559_v0 }
 0x436   : > { %1583 = vmatpush.msrb.mxu1 %v1558_v1 }
 0x438   : > { %1584 = vmatpush.msrb.mxu1 %v1557_v2 }
 0x43a   : > { %1585 = vmatpush.msrb.mxu1 %v1556_v3 }
 0x43c   : > { %1586 = vmatpush.msrb.mxu1 %v1555_v4 }
 0x4a5   : > { %v1250_v7 = vpop.f32.mrf.mxu0 }
 0x4a6   : > { %v1273_v8 = vpop.f32.mrf.mxu1 }
 0x4a7   : > { %v1274_v9 = vadd.f32 %v1273_v8, %v1250_v7  ;;  %v1554_v8 = vld [vmem:[%s2809_s13 + $0x10] sm:$0xff] }
 0x4a8   : > { %1587 = vmatpush.msrb.mxu1 %v1554_v8 }
 0x4aa   : > { %v1306_v63 = vpop.f32.mrf.mxu2 }
 0x4ab   : > { %v1309_v62 = vadd.f32 %v1306_v63, %v1274_v9  ;;  %v1553_v9 = vld [vmem:[%s2809_s13 + $0x8] sm:$0xff]  ;;  %v1607_v63 = vld [vmem:[%s2811_s15 + $0x60] sm:$0xf] }
 0x4ac   : > { %1588 = vmatpush.msrb.mxu1 %v1553_v9  ;;  %1924 = vmatpush.msk.msra.mxu2 %vm1570_vm7, %v1607_v63 }
 0x4ad   : > { %v1314_v11 = vadd.f32 %v1980_v10, %v1309_v62  ;;  %v1552_v10 = vld [vmem:[%s2809_s13] sm:$0xff]  ;;  %v1606_v62 = vld [vmem:[%s2811_s15 + $0x58] sm:$0xff] }
 0x4ae   : > { %1589 = vmatpush.msrb.mxu1 %v1552_v10  ;;  %1619 = vmatpush.msra.mxu2 %v1606_v62 }
 0x4af   : > { %v1315_v12 = vmax.f32 %v1314_v11, 0.0  ;;  %v1605_v11 = vld [vmem:[%s2811_s15 + $0x50] sm:$0xff] }
 0x4b0   : > { %1620 = vmatpush.msra.mxu2 %v1605_v11 }
 0x4b1   : > { %1356 = vmatpush.msra.mxu3 %v1315_v12  ;;  %1334 = vmatpush.msra.mxu0 %v1315_v12  ;;  %v1604_v12 = vld [vmem:[%s2811_s15 + $0x48] sm:$0xff] }
 0x4b2   : > { %1897 = vmatmul.msk.f32.vlgmr.msra.gmra.mxu3 %vm1316_vm3, %v2298_v57  ;;  %1896 = vmatmul.msk.f32.vlgmr.msra.gmra.mxu0 %vm1316_vm3, %v2301_v58 }
 0x4b3   : > { %1394 = vmatpush.msrb.mxu0 %v1905_v13  ;;  %v1603_v13 = vld [vmem:[%s2811_s15 + $0x40] sm:$0xff]  ;;  %1621 = vmatpush.msra.mxu2 %v1604_v12 }
 0x4b5   : > { %1395 = vmatpush.msrb.mxu0 %v1904_v15  ;;  %1622 = vmatpush.msra.mxu2 %v1603_v13  ;;  %v1601_v15 = vld [vmem:[%s2811_s15 + $0x30] sm:$0xff] }
 0x4b7   : > { %1396 = vmatpush.msrb.mxu0 %v1903_v18  ;;  %1623 = vmatpush.msra.mxu2 %v1602_v14  ;;  %v1598_v18 = vld [vmem:[%s2811_s15 + $0x18] sm:$0xff] }
 0x4b9   : > { %1397 = vmatpush.msrb.mxu0 %v1902_v21  ;;  %1624 = vmatpush.msra.mxu2 %v1601_v15 }
 0x4bb   : > { %1398 = vmatpush.msrb.mxu0 %v1901_v24  ;;  %1625 = vmatpush.msra.mxu2 %v1600_v16  ;;  %v1596_v24 = vld [vmem:[%s2811_s15 + $0x8] sm:$0xff] }
 0x4bd   : > { %1399 = vmatpush.msrb.mxu0 %v1900_v27  ;;  %1626 = vmatpush.msra.mxu2 %v1599_v17 }
 0x4bf   : > { %1400 = vmatpush.msrb.mxu0 %v1899_v31  ;;  %1627 = vmatpush.msra.mxu2 %v1598_v18 }
 0x4c1   : > { %1401 = vmatpush.msrb.mxu0 %v1898_v33  ;;  %1628 = vmatpush.msra.mxu2 %v1597_v23 }
 0x4c3   : > { %1539 = vmatpush.msra.mxu0 %v1526_v41  ;;  %1629 = vmatpush.msra.mxu2 %v1596_v24  ;;  %v1644_v41 = vld [vmem:[%s2813_s17 + $0x30] sm:$0xff] }
 0x4c5   : > { %1540 = vmatpush.msra.mxu0 %v1525_v42  ;;  %1630 = vmatpush.msra.mxu2 %v1595_v25  ;;  %v1643_v42 = vld [vmem:[%s2813_s17 + $0x28] sm:$0xff] }
 0x4c7   : > { %1541 = vmatpush.msra.mxu0 %v1524_v56 }
 0x4c9   : > { %1542 = vmatpush.msra.mxu0 %v1523_v51 }
 0x4cb   : > { %1543 = vmatpush.msra.mxu0 %v1522_v52  ;;  %v1651_v52 = vld [vmem:[%s2814_s18] sm:$0x1] }
 0x52f   : > { %v1336_v35 = vpop.f32.mrf.mxu0 }
 0x535   : > { %v1358_v36 = vpop.f32.mrf.mxu3 }
 0x536   : > { %v1361_v37 = vmax.f32 %v1336_v35, %v1358_v36  ;;  %v1650_v35 = vld [vmem:[%s2813_s17 + $0x60] sm:$0xf]  ;;  %v1649_v36 = vld [vmem:[%s2813_s17 + $0x58] sm:$0xff] }
 0x538   : > { %1363 = vst.msk [vmem:[#allocation5] sm:$0xf] %vm1362_vm4, %v1361_v37  ;;  %v1648_v37 = vld [vmem:[%s2813_s17 + $0x50] sm:$0xff] }
 0x53f   : > { %v1429_v38 = vld [vmem:[#allocation5 + $0x2] sm:$0x3]  ;;  %v1364_v40 = vld [vmem:[#allocation5] sm:$0x3] }
 0x540   : > { %v1373_v39 = vld [vmem:[#allocation5 + $0x1] sm:$0x3]  ;;  %1916 = vmatmul.msk.f32.vlgmr.msrb.gmra.mxu2 %vm1206_vm1, %v1429_v38  ;;  %1907 = vmatmul.msk.f32.vlgmr.msra.gmra.mxu1 %vm1206_vm1, %v1364_v40  ;;  %v1645_v40 = vld [vmem:[%s2813_s17 + $0x38] sm:$0xff] }
 0x541   : > { %1906 = vmatmul.msk.f32.vlgmr.msrb.gmra.mxu0 %vm1206_vm1, %v1373_v39  ;;  %v1647_v38 = vld [vmem:[%s2813_s17 + $0x48] sm:$0xff]  ;;  %v1646_v39 = vld [vmem:[%s2813_s17 + $0x40] sm:$0xff] }
 0x5bd   : > { %v1426_v44 = vpop.f32.mrf.mxu1 }
 0x5be   : > { %v1403_v43 = vpop.f32.mrf.mxu0 }
 0x5bf   : > { %v1427_v45 = vadd.f32 %v1426_v44, %v1403_v43  ;;  %v1642_v43 = vld [vmem:[%s2813_s17 + $0x20] sm:$0xff]  ;;  %v1641_v44 = vld [vmem:[%s2813_s17 + $0x18] sm:$0xff] }
 0x5c3   : > { %v1459_v47 = vpop.f32.mrf.mxu2 }
 0x5c4   : > { %v1462_v48 = vadd.f32 %v1459_v47, %v1427_v45  ;;  %v1640_v45 = vld [vmem:[%s2813_s17 + $0x10] sm:$0xff]  ;;  %v1638_v47 = vld [vmem:[%s2813_s17] sm:$0xff] }
 0x5c6   : > { %v1467_v49 = vadd.f32 %v1981_v46, %v1462_v48  ;;  %v1639_v46 = vld [vmem:[%s2813_s17 + $0x8] sm:$0xff] }
 0x5c8   : > { %v1468_v50 = vmax.f32 %v1467_v49, 0.0 }
 0x5ca   : > { %1917 = vmatpush.msk.msrb.mxu3 %vm1472_vm5, %v1468_v50 }
 0x5cb   : > { %1918 = vmatmul.msk.f32.vlgmr.msrb.gmra.mxu3 %vm1469_vm6, %v2301_v58  ;;  %v1521_v58 = vld [vmem:[%s2807_s11 + $0x10] sm:$0xff] }
 0x5cc   : > { %1919 = vmatpush.msk.msra.mxu3 %vm1472_vm5, %v1468_v50  ;;  %1544 = vmatpush.msra.mxu0 %v1521_v58 }
 0x5ce   : > { %1926 = vmatpush.msk.msrb.mxu3 %vm1570_vm7, %v1650_v35 }
 0x5d0   : > { %1664 = vmatpush.msrb.mxu3 %v1649_v36 }
 0x5d2   : > { %1665 = vmatpush.msrb.mxu3 %v1648_v37 }
 0x5d3   : > { %1920 = vmatmul.msk.f32.vlgmr.msra.gmra.mxu3 %vm1469_vm6, %v2298_v57  ;;  %v1520_v57 = vld [vmem:[%s2807_s11 + $0x8] sm:$0xff] }
 0x5d4   : > { %1545 = vmatpush.msra.mxu0 %v1520_v57  ;;  %1666 = vmatpush.msrb.mxu3 %v1647_v38 }
 0x5d6   : > { %1546 = vmatpush.msra.mxu0 %v1519_v53  ;;  %1667 = vmatpush.msrb.mxu3 %v1646_v39 }
 0x5d8   : > { %1668 = vmatpush.msrb.mxu3 %v1645_v40 }
 0x5da   : > { %1669 = vmatpush.msrb.mxu3 %v1644_v41 }
 0x5dc   : > { %1670 = vmatpush.msrb.mxu3 %v1643_v42 }
 0x5de   : > { %1671 = vmatpush.msrb.mxu3 %v1642_v43 }
 0x5e0   : > { %1672 = vmatpush.msrb.mxu3 %v1641_v44 }
 0x5e2   : > { %1673 = vmatpush.msrb.mxu3 %v1640_v45 }
 0x5e4   : > { %1674 = vmatpush.msrb.mxu3 %v1639_v46 }
 0x5e6   : > { %1675 = vmatpush.msrb.mxu3 %v1638_v47 }
 0x64e   : > { %v1493_v5 = vpop.f32.mrf.mxu3 }
 0x656   : > { %v1515_v6 = vpop.f32.mrf.mxu3 }
 0x657   : > { %v1518_v7 = vmax.f32 %v1493_v5, %v1515_v6 }
 0x659   : > { %1921 = vmatmul.msk.f32.vlgmr.msra.gmra.mxu0 %vm1206_vm1, %v1518_v7 }
 0x6d6   : > { %v1548_v20 = vpop.f32.mrf.mxu0 }
 0x6d7   : > { %v1549_v21 = vadd.f32 %v1548_v20, %v1527_v19 }
 0x6d9   : > { %v1551_v22 = vmax.f32 %v1549_v21, 0.0 }
 0x6db   : > { %1923 = vmatmul.msk.f32.vlgmr.msrb.gmra.mxu1 %vm1566_vm8, %v1551_v22 }
 0x758   : > { %v1591_v27 = vpop.f32.mrf.mxu1 }
 0x759   : > { %v1592_v28 = vadd.f32 %v1591_v27, %v1565_v26 }
 0x75b   : > { %v1594_v29 = vmax.f32 %v1592_v28, 0.0 }
 0x75d   : > { %1925 = vmatmul.msk.f32.vlgmr.msra.gmra.mxu2 %vm1566_vm8, %v1594_v29 }
 0x7e0   : > { %v1632_v31 = vpop.f32.mrf.mxu2 }
 0x7e1   : > { %v1633_v32 = vadd.f32 %v1632_v31, %v1608_v30 }
 0x7e3   : > { %vm1635_vm9 = vcmp.ge.f32.partialorder %v1633_v32, 0.0  ;;  %v1636_v33 = vmul.f32 0.01, %v1633_v32  ;;  %v1681_v48 = vsel %vm1680_vm10, %v1633_v32, -inf }
 0x7e5   : > { %v1637_v34 = vsel %vm1635_vm9, %v1633_v32, %v1636_v33 }
 0x7e6   : > { %1653 = vrot.lane.b32.xlu0 %v1637_v34, %s2087_s4  ;;  %s2004_s4 = sshra.s32 %s1726_s20, 4  ;;  %s2005_s4 = int_to_ptr.hbm [resolvable:$true] %s2004_s4 }
 0x7e7   : > { %s2006_s27 = scalar_lea.hbm %s2005_s4, 1  ;;  %p2011_p0 = scmp.lt.s32.totalorder %s2005_s4, %s2856_s30 }
 0x7e8   : > { %p2007_p11 = scmp.ne.s32.totalorder %s2005_s4, %s2006_s27  ;;  %p2012_p1 = scmp.lt.s32.totalorder %s2010_s26, %s2006_s27 }
 0x7ea   : > { %p2008_p12 = pnand %p2007_p11, %p2231_p5  ;;  %p2013_p2 = por %p2012_p1, %p2011_p0 }
 0x7ec   : > { %p2009_p13 = pneg %p2008_p12 }
 0x7ee   : > { %p2014_p3 = pnand %p2013_p2, %p2009_p13 }
 0x810   : > { %1682 = vmax.xlane.f32.xlu0 %v1681_v48 }
 0x858   : > { %v1654_v49 = vpop.permute.xlu0 %1653 }
 0x859   : > { %1927 = vmatmul.msk.f32.vlgmr.msrb.gmra.mxu3 %vm1566_vm8, %v1654_v49 }
 0x883   : > { %v1683_v50 = vpop.xlane.xlu0 %1682 }
 0x884   : > { %v1684_v56 = vsub.f32 %v1633_v32, %v1683_v50 }
 0x886   : > { %v1685_v51 = vmul.f32 1.442695, %v1684_v56 }
 0x888   : > { %1982 = vpow2.f32 %v1685_v51 }
 0x88e   : > { %v1983_v54 = vpop.eup %1982 }
 0x88f   : > { %v1687_v55 = vsel %vm1680_vm10, %v1983_v54, 0.0 }
 0x8dc   : > { %v1677_v58 = vpop.f32.mrf.mxu3 }
 0x8dd   : > { %v1678_v57 = vadd.f32 %v1677_v58, %v1651_v52 }
 0x8df   : > { %v1695_v53 = vsel %vm1694_vm11, %v1678_v57, -inf }
 0x8e0   : > { %1696 = vmax.xlane.f32.xlu1 %v1695_v53 }
 0x8e8   : > { %1688 = vadd.xlane.f32.xlu1 %v1687_v55 }
 0x953   : > { %v1697_v59 = vpop.xlane.xlu1 %1696 }
 0x954   : > { %v1698_v60 = vsub.f32 %v1678_v57, %v1697_v59 }
 0x956   : > { %v1699_v61 = vmul.f32 1.442695, %v1698_v60 }
 0x958   : > { %1984 = vpow2.f32 %v1699_v61 }
 0x95b   : > { %v1689_v0 = vpop.xlane.xlu1 %1688 }
 0x95c   : > { %1986 = vlog2.f32 %v1689_v0 }
 0x95e   : > { %v1985_v1 = vpop.eup %1984 }
 0x95f   : > { %v1701_v2 = vsel %vm1694_vm11, %v1985_v1, 0.0 }
 0x960   : > { %1702 = vadd.xlane.f32.xlu2 %v1701_v2 }
 0x962   : > { %v1987_v3 = vpop.eup %1986 }
 0x963   : > { %v1691_v4 = vmul.f32 0.6931472, %v1987_v3 }
 0x965   : > { %v1692_v5 = vsub.f32 %v1684_v56, %v1691_v4 }
 0x967   : > { %1693 = vst.msk [vmem:[%s625_s25] sm:$0x1] %vm1680_vm10, %v1692_v5 }
 0x968   : > { %2017 = shalt.err (!%p2014_p3)
}
 0x969   : > { %1931 = dma.vmem_to_hbm [thread:$0]  (%p2231_p5), %s1724_s19, 16, %s1726_s20, %s1709_s24  }
 0x96a   : > { %s2858_s23 = sld [smem:[#allocation27_spill]]  ;;  %s631_s3 = scalar_lea.vmem [#allocation8], %s2742_s1 }
 0x96b   : > { %s1736_s4 = sshll.u32 %s631_s3, 4  ;;  %s1713_s26 = scalar_lea.sflag [#allocation9], %s2742_s1  ;;  %s1737_s4 = int_to_ptr.vmem [resolvable:$true] %s1736_s4 }
 0x970   : > { %s2859_s29 = smov %s2858_s23  ;;  %s1734_s6 = scalar_lea.hbm %s2858_s23, %s2214_s2 }
 0x971   : > { %s1738_s27 = sshll.u32 %s1734_s6, 4  ;;  %s2038_s20 = scalar_lea.hbm %s2859_s29, 2  ;;  %s1739_s27 = int_to_ptr.hbm [resolvable:$true] %s1738_s27 }
 0x972   : > { %s2032_s0 = sshra.s32 %s1739_s27, 4  ;;  %s2033_s0 = int_to_ptr.hbm [resolvable:$true] %s2032_s0 }
 0x973   : > { %s2034_s19 = scalar_lea.hbm %s2033_s0, 1  ;;  %p2039_p9 = scmp.lt.s32.totalorder %s2033_s0, %s2859_s29 }
 0x974   : > { %p2035_p4 = scmp.ne.s32.totalorder %s2033_s0, %s2034_s19  ;;  %p2040_p10 = scmp.lt.s32.totalorder %s2038_s20, %s2034_s19 }
 0x976   : > { %p2036_p7 = pnand %p2035_p4, %p2231_p5  ;;  %p2041_p11 = por %p2040_p10, %p2039_p9 }
 0x978   : > { %p2037_p8 = pneg %p2036_p7 }
 0x97a   : > { %p2042_p12 = pnand %p2041_p11, %p2037_p8 }
 0x9d3   : > { %v1703_v6 = vpop.xlane.xlu2 %1702 }
 0x9d4   : > { %1988 = vlog2.f32 %v1703_v6 }
 0x9da   : > { %v1989_v7 = vpop.eup %1988 }
 0x9db   : > { %v1705_v8 = vmul.f32 0.6931472, %v1989_v7 }
 0x9dd   : > { %v1706_v9 = vsub.f32 %v1698_v60, %v1705_v8 }
 0x9df   : > { %1707 = vst.msk [vmem:[%s631_s3] sm:$0x1] %vm1694_vm11, %v1706_v9 }
 0x9e0   : > { %2045 = shalt.err (!%p2042_p12)
}
 0x9e1   : > { %1932 = dma.vmem_to_hbm [thread:$0]  (%p2231_p5), %s1737_s4, 16, %s1739_s27, %s1713_s26  }
 0x9e2 PF: > { %s2860_s1 = sld [smem:[#allocation14_spill]] }
 0x9e3   : > { %s2861_s25 = sld [smem:[#allocation12_spill]] }
 0x9e8   : > { %p1942_p13 = scmp.ge.s32.totalorder %s2860_s1, 2 }
 0x9e9   : > { %s1750_s3 = sand.u32 1, %s2861_s25  }
 0x9ea   : > { %p1936_p0 = pnand %p1942_p13, %p2235_p6  ;;  %s1751_s5 = scalar_lea.sflag [#allocation7], %s1750_s3 }
 0x9ec   : > { %p1937_p1 = pneg %p1936_p0 }
 0x9ee   : > { %2063 = dma.done.wait (%p1937_p1), %s1751_s5, 16  }
 0x9ef   : > { %2065 = vsyncadd (%p1937_p1), %s1751_s5, 4294967280  ;;  %s1760_s0 = scalar_lea.sflag [#allocation9], %s1750_s3 }
 0x9f0   : > { %2067 = dma.done.wait (%p1937_p1), %s1760_s0, 16  }
 0x9f1   : > { %2069 = vsyncadd (%p1937_p1), %s1760_s0, 4294967280  ;;  %s2863_s24 = sld [smem:[#allocation15_spill]]  ;;  %s2866_s1 = smov %s2076_s22 }
 0x9f2   : > { %s2864_s19 = sld [smem:[#allocation13_spill]] }
 0x9f3   : > { %s2865_s23 = sld [smem:[#allocation16_spill]] }
 0x9f7   : > { %p34_p5 = scmp.ge.s32.totalorder %s2863_s24, 4  }
 0x9f8   : > { %s2867_s22 = smov %s2864_s19 }
 0x9f9   :  { %36 = sbr.rel (!%p34_p5) target bundleno = 15 (0xf), region = 155 }
 0x9fe   :  { %1765 = vsyncpa [#allocation7], 1 }
 0x9ff   :  { %1767 = vsyncpa [#allocation7 + $0x1], 1 }
 0xa00   :  { %1768 = vsyncpa [#allocation9], 1 }
 0xa01   :  { %1770 = vsyncpa [#allocation9 + $0x1], 1 }

</bundles_post_ra>
